<compile_context>
chip_gen: v6e
topology: v6e:2x2x1
jax: 0.10.0
libtpu: 0.0.40
codegen_flags: <defaults>
</compile_context>

<pallas_src>
import math

import jax
import jax.numpy as jnp
from jax.experimental import pallas as pl

# ---- model hyper-parameters --------------------------------------------------
D_MODEL = 32
N_HEADS = 4
D_K = D_MODEL // N_HEADS
D_FF = 64
EPS = 1e-6            # LayerNormalization eps (added to std, not var!)
NEG_INF = -1e9        # masked_fill value used by the PyTorch code
INV_SQRT_DK = 1.0 / math.sqrt(D_K)

# Column offsets inside the fused (D_MODEL, 8*D_MODEL + D_FF) weight slab.
_OFF_QKV_SA = 0
_OFF_WO_SA = 3 * D_MODEL
_OFF_WQ_CA = 4 * D_MODEL
_OFF_WKV_CA = 5 * D_MODEL
_OFF_WO_CA = 7 * D_MODEL
_OFF_W1 = 8 * D_MODEL
_W_SLAB_COLS = 8 * D_MODEL + D_FF


# =============================== kernel helpers ===============================

def _layer_norm(x, alpha, bias):
    """PyTorch LayerNormalization: alpha * (x - mean) / (std + eps) + bias.
    torch.std() is unbiased (ddof=1); eps is added to std."""
    d = x.shape[-1]
    mean = jnp.mean(x, axis=-1, keepdims=True)
    xc = x - mean
    var_unbiased = jnp.sum(xc * xc, axis=-1, keepdims=True) * (1.0 / (d - 1))
    inv = pl.reciprocal(jnp.sqrt(var_unbiased) + EPS)   # exact; EUP slot
    return alpha * (xc * inv) + bias


def _mha(q, k, v, add_mask, wo):
    """Multi-head attention, statically unrolled over heads.

    q: (Sq, D) (already scaled by 1/sqrt(d_k) via the weights);
    k, v: (Sk, D); add_mask broadcastable to (Sq, Sk) with 0 / -1e9 entries;
    wo: (D, D).  Per-head contributions through Wo are accumulated, which
    equals concat(heads, axis=-1) @ Wo, so no lane-dim concat is required.
    """
    acc = None
    for h in range(N_HEADS):
        sl = slice(h * D_K, (h + 1) * D_K)
        s = jnp.dot(q[:, sl], k[:, sl].T, preferred_element_type=jnp.float32)
        s = s + add_mask
        s = s - jnp.max(s, axis=-1, keepdims=True)
        p = jnp.exp(s)
        p = p * pl.reciprocal(jnp.sum(p, axis=-1, keepdims=True))
        oh = jnp.dot(p, v[:, sl], preferred_element_type=jnp.float32)
        contrib = jnp.dot(oh, wo[sl, :], preferred_element_type=jnp.float32)
        acc = contrib if acc is None else acc + contrib
    return acc


# ============================ fused decoder kernel ============================

def decoder_block_kernel(x_ref, enc_ref, tgt_m_ref, src_m_ref,
                         w_ref, w2_ref, v_ref, o_ref):
    B, S, D = x_ref.shape
    S_enc = enc_ref.shape[1]

    # Batch-folded activations (sublane merge; last dim unchanged).
    x = x_ref[...].reshape(B * S, D)
    enc = enc_ref[...].reshape(B * S_enc, D)
    tgt_m = tgt_m_ref[...]          # (S, S) additive mask
    src_m = src_m_ref[...]          # (1, S_enc) additive mask (broadcasts)

    w = w_ref[...]                  # (D, 8D + D_FF) fused weight slab
    wqkv_sa = w[:, _OFF_QKV_SA:_OFF_WO_SA]
    wo_sa = w[:, _OFF_WO_SA:_OFF_WQ_CA]
    wq_ca = w[:, _OFF_WQ_CA:_OFF_WKV_CA]
    wkv_ca = w[:, _OFF_WKV_CA:_OFF_WO_CA]
    wo_ca = w[:, _OFF_WO_CA:_OFF_W1]
    w1 = w[:, _OFF_W1:_OFF_W1 + D_FF]
    w2 = w2_ref[...]                # (D_FF, D)

    # ---- residual 1: pre-norm self-attention --------------------------------
    xn = _layer_norm(x, v_ref[0:1, 0:D], v_ref[1:2, 0:D])
    qkv = jnp.dot(xn, wqkv_sa, preferred_element_type=jnp.float32)  # (B*S, 3D)
    sa_outs = []
    for b in range(B):
        rows = slice(b * S, (b + 1) * S)
        sa_outs.append(_mha(qkv[rows, 0:D], qkv[rows, D:2 * D],
                            qkv[rows, 2 * D:3 * D], tgt_m, wo_sa))
    x = x + jnp.concatenate(sa_outs, axis=0)

    # ---- residual 2: pre-norm cross-attention (K/V from encoder output) -----
    xn = _layer_norm(x, v_ref[2:3, 0:D], v_ref[3:4, 0:D])
    q = jnp.dot(xn, wq_ca, preferred_element_type=jnp.float32)       # (B*S, D)
    kv = jnp.dot(enc, wkv_ca, preferred_element_type=jnp.float32)    # (B*Se, 2D)
    ca_outs = []
    for b in range(B):
        qrows = slice(b * S, (b + 1) * S)
        krows = slice(b * S_enc, (b + 1) * S_enc)
        ca_outs.append(_mha(q[qrows, :], kv[krows, 0:D],
                            kv[krows, D:2 * D], src_m, wo_ca))
    x = x + jnp.concatenate(ca_outs, axis=0)

    # ---- residual 3: pre-norm feed-forward -----------------------------------
    xn = _layer_norm(x, v_ref[4:5, 0:D], v_ref[5:6, 0:D])
    h = jnp.dot(xn, w1, preferred_element_type=jnp.float32) + v_ref[6:7, 0:D_FF]
    h = jnp.maximum(h, 0.0)
    x = x + jnp.dot(h, w2, preferred_element_type=jnp.float32) + v_ref[7:8, 0:D]

    o_ref[...] = x.reshape(B, S, D)


# ====================== one-time parameter / mask preparation ================

def _pad_row(v, width):
    v = jnp.asarray(v, jnp.float32).reshape(-1)
    return jnp.pad(v, (0, width - v.shape[0]))


def _additive_mask(mask):
    """0 where mask!=0, -1e9 where mask==0; leading singleton dims dropped."""
    m = jnp.where(mask == 0, jnp.float32(NEG_INF), jnp.float32(0.0))
    return m.reshape(m.shape[-2], m.shape[-1])   # masks are (1,1,Sq,Sk)


def prepare_decoder_params(params, src_mask, tgt_mask):
    """Done ONCE (not on the per-call path): fuse weights, fold 1/sqrt(dk),
    pack small vectors, build additive masks."""
    wq_sa = params["sa"]["Wq"] * INV_SQRT_DK
    wqkv_sa = jnp.concatenate([wq_sa, params["sa"]["Wk"], params["sa"]["Wv"]],
                              axis=1)
    wq_ca = params["ca"]["Wq"] * INV_SQRT_DK
    wkv_ca = jnp.concatenate([params["ca"]["Wk"], params["ca"]["Wv"]], axis=1)

    w_slab = jnp.concatenate(
        [wqkv_sa, params["sa"]["Wo"], wq_ca, wkv_ca, params["ca"]["Wo"],
         params["ffn"]["W1"]], axis=1).astype(jnp.float32)
    assert w_slab.shape == (D_MODEL, _W_SLAB_COLS)

    vec_slab = jnp.stack([
        _pad_row(params["ln1_a"], D_FF), _pad_row(params["ln1_b"], D_FF),
        _pad_row(params["ln2_a"], D_FF), _pad_row(params["ln2_b"], D_FF),
        _pad_row(params["ln3_a"], D_FF), _pad_row(params["ln3_b"], D_FF),
        _pad_row(params["ffn"]["b1"], D_FF), _pad_row(params["ffn"]["b2"], D_FF),
    ])                                                     # (8, D_FF)

    return {
        "w_slab": w_slab,
        "w2": params["ffn"]["W2"].astype(jnp.float32),
        "vec_slab": vec_slab,
        "tgt_add": _additive_mask(tgt_mask),               # (S, S)
        "src_add": _additive_mask(src_mask),               # (1, S_enc)
    }


# ============================== pallas_call wrapper ===========================

def decoder_block(x, enc_out, prepped):
    B, S, D = x.shape
    # No grid: the whole (tiny) batch is one step; full arrays live in VMEM.
    return pl.pallas_call(
        decoder_block_kernel,
        out_shape=jax.ShapeDtypeStruct((B, S, D), jnp.float32),
    )(x, enc_out, prepped["tgt_add"], prepped["src_add"],
      prepped["w_slab"], prepped["w2"], prepped["vec_slab"])


# ============================ pure-JAX reference ==============================

def ref_layernorm(x, a, b):
    mean = x.mean(-1, keepdims=True)
    std = jnp.std(x, axis=-1, keepdims=True, ddof=1)
    return a * (x - mean) / (std + EPS) + b


def ref_mha(q_in, k_in, v_in, mask, p):
    B, Sq, D = q_in.shape
    Sk = k_in.shape[1]
    q = (q_in @ p["Wq"]).reshape(B, Sq, N_HEADS, D_K).transpose(0, 2, 1, 3)
    k = (k_in @ p["Wk"]).reshape(B, Sk, N_HEADS, D_K).transpose(0, 2, 1, 3)
    v = (v_in @ p["Wv"]).reshape(B, Sk, N_HEADS, D_K).transpose(0, 2, 1, 3)
    s = q @ jnp.swapaxes(k, -2, -1) / math.sqrt(D_K)
    s = jnp.where(mask == 0.0, NEG_INF, s)
    a = jax.nn.softmax(s, axis=-1)
    o = (a @ v).transpose(0, 2, 1, 3).reshape(B, Sq, D)
    return o @ p["Wo"]


def ref_decoder(x, enc_out, src_mask, tgt_mask, params):
    xn = ref_layernorm(x, params["ln1_a"], params["ln1_b"])
    x = x + ref_mha(xn, xn, xn, tgt_mask, params["sa"])
    xn = ref_layernorm(x, params["ln2_a"], params["ln2_b"])
    x = x + ref_mha(xn, enc_out, enc_out, src_mask, params["ca"])
    xn = ref_layernorm(x, params["ln3_a"], params["ln3_b"])
    h = jnp.maximum(xn @ params["ffn"]["W1"] + params["ffn"]["b1"], 0.0)
    return x + (h @ params["ffn"]["W2"] + params["ffn"]["b2"])


# ==================================== main ====================================

def init_linear(key, din, dout, bias=True):
    k1, k2 = jax.random.split(key)
    bound = 1.0 / math.sqrt(din)
    w = jax.random.uniform(k1, (din, dout), jnp.float32, -bound, bound)
    b = (jax.random.uniform(k2, (1, dout), jnp.float32, -bound, bound)
         if bias else jnp.zeros((1, dout), jnp.float32))
    return w, b


if __name__ == "__main__":
    B, S_DEC, S_ENC = 2, 8, 8
    key = jax.random.PRNGKey(0)
    keys = jax.random.split(key, 12)

    def attn_params(ks):
        return {
            "Wq": init_linear(ks[0], D_MODEL, D_MODEL, bias=False)[0],
            "Wk": init_linear(ks[1], D_MODEL, D_MODEL, bias=False)[0],
            "Wv": init_linear(ks[2], D_MODEL, D_MODEL, bias=False)[0],
            "Wo": init_linear(ks[3], D_MODEL, D_MODEL, bias=False)[0],
        }

    W1, b1 = init_linear(keys[8], D_MODEL, D_FF)
    W2, b2 = init_linear(keys[9], D_FF, D_MODEL)

    params = {
        "sa": attn_params(keys[0:4]),
        "ca": attn_params(keys[4:8]),
        "ffn": {"W1": W1, "b1": b1, "W2": W2, "b2": b2},
        # LayerNormalization params: ones / zeros (matches nn.Parameter init)
        "ln1_a": jnp.ones((D_MODEL,), jnp.float32), "ln1_b": jnp.zeros((D_MODEL,), jnp.float32),
        "ln2_a": jnp.ones((D_MODEL,), jnp.float32), "ln2_b": jnp.zeros((D_MODEL,), jnp.float32),
        "ln3_a": jnp.ones((D_MODEL,), jnp.float32), "ln3_b": jnp.zeros((D_MODEL,), jnp.float32),
    }

    x = jax.random.normal(keys[10], (B, S_DEC, D_MODEL), jnp.float32)
    enc_out = jax.random.normal(keys[11], (B, S_ENC, D_MODEL), jnp.float32)

    # target mask: causal (1, 1, S_dec, S_dec); source mask: all ones (1, 1, 1, S_enc)
    tgt_mask = jnp.tril(jnp.ones((S_DEC, S_DEC), jnp.float32))[None, None]
    src_mask = jnp.ones((1, 1, 1, S_ENC), jnp.float32)

    # One-time prep (hoisted off the per-call path).
    prepped = jax.tree_util.tree_map(jax.block_until_ready,
                                     prepare_decoder_params(params, src_mask, tgt_mask))

    out = decoder_block(x, enc_out, prepped)
    out = jax.block_until_ready(out)

    ref = ref_decoder(x, enc_out, src_mask, tgt_mask, params)
    assert out.shape == (B, S_DEC, D_MODEL)
    assert jnp.allclose(out, ref, atol=1e-4, rtol=1e-4), \
        f"max abs err = {jnp.max(jnp.abs(out - ref))}"

    print("KERNEL_OK")
</pallas_src>

<mosaic_0001>
module attributes {stable_mosaic.version = 11 : i64} {
  func.func @decoder_block_kernel(%arg0: memref<2x8x32xf32, #tpu.memory_space<vmem>>, %arg1: memref<2x8x32xf32, #tpu.memory_space<vmem>>, %arg2: memref<8x8xf32, #tpu.memory_space<vmem>>, %arg3: memref<1x8xf32, #tpu.memory_space<vmem>>, %arg4: memref<32x320xf32, #tpu.memory_space<vmem>>, %arg5: memref<64x32xf32, #tpu.memory_space<vmem>>, %arg6: memref<8x64xf32, #tpu.memory_space<vmem>>, %arg7: memref<2x8x32xf32, #tpu.memory_space<vmem>>) attributes {dimension_semantics = [], scalar_prefetch = 0 : i64, scratch_operands = 0 : i64, tpu.core_type = #tpu.core_type<tc>} {
    %c0 = arith.constant 0 : index
    %c0_0 = arith.constant 0 : index
    %c0_1 = arith.constant 0 : index
    %0 = vector.load %arg0[%c0, %c0_0, %c0_1] : memref<2x8x32xf32, #tpu.memory_space<vmem>>, vector<2x8x32xf32>
    %1 = vector.shape_cast %0 : vector<2x8x32xf32> to vector<16x32xf32>
    %c0_2 = arith.constant 0 : index
    %c0_3 = arith.constant 0 : index
    %c0_4 = arith.constant 0 : index
    %2 = vector.load %arg1[%c0_2, %c0_3, %c0_4] : memref<2x8x32xf32, #tpu.memory_space<vmem>>, vector<2x8x32xf32>
    %3 = vector.shape_cast %2 : vector<2x8x32xf32> to vector<16x32xf32>
    %c0_5 = arith.constant 0 : index
    %c0_6 = arith.constant 0 : index
    %4 = vector.load %arg2[%c0_5, %c0_6] : memref<8x8xf32, #tpu.memory_space<vmem>>, vector<8x8xf32>
    %c0_7 = arith.constant 0 : index
    %c0_8 = arith.constant 0 : index
    %5 = vector.load %arg3[%c0_7, %c0_8] : memref<1x8xf32, #tpu.memory_space<vmem>>, vector<1x8xf32>
    %c0_9 = arith.constant 0 : index
    %c0_10 = arith.constant 0 : index
    %6 = vector.load %arg4[%c0_9, %c0_10] : memref<32x320xf32, #tpu.memory_space<vmem>>, vector<32x320xf32>
    %7 = vector.extract_strided_slice %6 {offsets = [0, 0], sizes = [32, 96], strides = [1, 1]} : vector<32x320xf32> to vector<32x96xf32>
    %8 = vector.extract_strided_slice %6 {offsets = [0, 96], sizes = [32, 32], strides = [1, 1]} : vector<32x320xf32> to vector<32x32xf32>
    %9 = vector.extract_strided_slice %6 {offsets = [0, 128], sizes = [32, 32], strides = [1, 1]} : vector<32x320xf32> to vector<32x32xf32>
    %10 = vector.extract_strided_slice %6 {offsets = [0, 160], sizes = [32, 64], strides = [1, 1]} : vector<32x320xf32> to vector<32x64xf32>
    %11 = vector.extract_strided_slice %6 {offsets = [0, 224], sizes = [32, 32], strides = [1, 1]} : vector<32x320xf32> to vector<32x32xf32>
    %12 = vector.extract_strided_slice %6 {offsets = [0, 256], sizes = [32, 64], strides = [1, 1]} : vector<32x320xf32> to vector<32x64xf32>
    %c0_11 = arith.constant 0 : index
    %c0_12 = arith.constant 0 : index
    %13 = vector.load %arg5[%c0_11, %c0_12] : memref<64x32xf32, #tpu.memory_space<vmem>>, vector<64x32xf32>
    %c0_13 = arith.constant 0 : index
    %c0_14 = arith.constant 0 : index
    %14 = vector.load %arg6[%c0_13, %c0_14] : memref<8x64xf32, #tpu.memory_space<vmem>>, vector<1x32xf32>
    %c1 = arith.constant 1 : index
    %c0_15 = arith.constant 0 : index
    %15 = vector.load %arg6[%c1, %c0_15] : memref<8x64xf32, #tpu.memory_space<vmem>>, vector<1x32xf32>
    %cst = arith.constant dense<0.000000e+00> : vector<16xf32>
    %16 = vector.multi_reduction <add>, %1, %cst [1] : vector<16x32xf32> to vector<16xf32>
    %17 = vector.shape_cast %16 : vector<16xf32> to vector<16x1xf32>
    %cst_16 = arith.constant 3.200000e+01 : f32
    %18 = vector.broadcast %cst_16 : f32 to vector<16x1xf32>
    %19 = arith.divf %17, %18 : vector<16x1xf32>
    %20 = vector.broadcast %19 : vector<16x1xf32> to vector<16x32xf32>
    %21 = arith.subf %1, %20 : vector<16x32xf32>
    %22 = arith.mulf %21, %21 : vector<16x32xf32>
    %cst_17 = arith.constant dense<0.000000e+00> : vector<16xf32>
    %23 = vector.multi_reduction <add>, %22, %cst_17 [1] : vector<16x32xf32> to vector<16xf32>
    %24 = vector.shape_cast %23 : vector<16xf32> to vector<16x1xf32>
    %cst_18 = arith.constant 0.0322580636 : f32
    %25 = vector.broadcast %cst_18 : f32 to vector<16x1xf32>
    %26 = arith.mulf %24, %25 : vector<16x1xf32>
    %27 = math.sqrt %26 : vector<16x1xf32>
    %cst_19 = arith.constant 9.99999997E-7 : f32
    %28 = vector.broadcast %cst_19 : f32 to vector<16x1xf32>
    %29 = arith.addf %27, %28 : vector<16x1xf32>
    %30 = tpu.reciprocal %29 : vector<16x1xf32> -> vector<16x1xf32>
    %31 = vector.broadcast %30 : vector<16x1xf32> to vector<16x32xf32>
    %32 = arith.mulf %21, %31 : vector<16x32xf32>
    %33 = vector.broadcast %14 : vector<1x32xf32> to vector<16x32xf32>
    %34 = arith.mulf %33, %32 : vector<16x32xf32>
    %35 = vector.broadcast %15 : vector<1x32xf32> to vector<16x32xf32>
    %36 = arith.addf %34, %35 : vector<16x32xf32>
    %cst_20 = arith.constant dense<0.000000e+00> : vector<16x96xf32>
    %37 = tpu.matmul %36, %7, %cst_20 {dimension_numbers = #tpu.dot_dimension_numbers<[1], [0], [0], [1], [0, 0, 1, 1], [], []>} : vector<16x32xf32>, vector<32x96xf32>, vector<16x96xf32> -> vector<16x96xf32>
    %38 = vector.extract_strided_slice %37 {offsets = [0, 0], sizes = [8, 32], strides = [1, 1]} : vector<16x96xf32> to vector<8x32xf32>
    %39 = vector.extract_strided_slice %37 {offsets = [0, 32], sizes = [8, 32], strides = [1, 1]} : vector<16x96xf32> to vector<8x32xf32>
    %40 = vector.extract_strided_slice %37 {offsets = [0, 64], sizes = [8, 32], strides = [1, 1]} : vector<16x96xf32> to vector<8x32xf32>
    %41 = vector.extract_strided_slice %38 {offsets = [0, 0], sizes = [8, 8], strides = [1, 1]} : vector<8x32xf32> to vector<8x8xf32>
    %42 = vector.extract_strided_slice %39 {offsets = [0, 0], sizes = [8, 8], strides = [1, 1]} : vector<8x32xf32> to vector<8x8xf32>
    %43 = tpu.transpose %42, [1, 0] : vector<8x8xf32> -> vector<8x8xf32>
    %cst_21 = arith.constant dense<0.000000e+00> : vector<8x8xf32>
    %44 = tpu.matmul %41, %43, %cst_21 {dimension_numbers = #tpu.dot_dimension_numbers<[1], [0], [0], [1], [0, 0, 1, 1], [], []>} : vector<8x8xf32>, vector<8x8xf32>, vector<8x8xf32> -> vector<8x8xf32>
    %45 = arith.addf %44, %4 : vector<8x8xf32>
    %cst_22 = arith.constant dense<0xFF800000> : vector<8xf32>
    %46 = vector.multi_reduction <maximumf>, %45, %cst_22 [1] : vector<8x8xf32> to vector<8xf32>
    %47 = vector.shape_cast %46 : vector<8xf32> to vector<8x1xf32>
    %48 = vector.broadcast %47 : vector<8x1xf32> to vector<8x8xf32>
    %49 = arith.subf %45, %48 : vector<8x8xf32>
    %50 = math.exp %49 : vector<8x8xf32>
    %cst_23 = arith.constant dense<0.000000e+00> : vector<8xf32>
    %51 = vector.multi_reduction <add>, %50, %cst_23 [1] : vector<8x8xf32> to vector<8xf32>
    %52 = vector.shape_cast %51 : vector<8xf32> to vector<8x1xf32>
    %53 = tpu.reciprocal %52 : vector<8x1xf32> -> vector<8x1xf32>
    %54 = vector.broadcast %53 : vector<8x1xf32> to vector<8x8xf32>
    %55 = arith.mulf %50, %54 : vector<8x8xf32>
    %56 = vector.extract_strided_slice %40 {offsets = [0, 0], sizes = [8, 8], strides = [1, 1]} : vector<8x32xf32> to vector<8x8xf32>
    %cst_24 = arith.constant dense<0.000000e+00> : vector<8x8xf32>
    %57 = tpu.matmul %55, %56, %cst_24 {dimension_numbers = #tpu.dot_dimension_numbers<[1], [0], [0], [1], [0, 0, 1, 1], [], []>} : vector<8x8xf32>, vector<8x8xf32>, vector<8x8xf32> -> vector<8x8xf32>
    %58 = vector.extract_strided_slice %8 {offsets = [0, 0], sizes = [8, 32], strides = [1, 1]} : vector<32x32xf32> to vector<8x32xf32>
    %cst_25 = arith.constant dense<0.000000e+00> : vector<8x32xf32>
    %59 = tpu.matmul %57, %58, %cst_25 {dimension_numbers = #tpu.dot_dimension_numbers<[1], [0], [0], [1], [0, 0, 1, 1], [], []>} : vector<8x8xf32>, vector<8x32xf32>, vector<8x32xf32> -> vector<8x32xf32>
    %60 = vector.extract_strided_slice %38 {offsets = [0, 8], sizes = [8, 8], strides = [1, 1]} : vector<8x32xf32> to vector<8x8xf32>
    %61 = vector.extract_strided_slice %39 {offsets = [0, 8], sizes = [8, 8], strides = [1, 1]} : vector<8x32xf32> to vector<8x8xf32>
    %62 = tpu.transpose %61, [1, 0] : vector<8x8xf32> -> vector<8x8xf32>
    %cst_26 = arith.constant dense<0.000000e+00> : vector<8x8xf32>
    %63 = tpu.matmul %60, %62, %cst_26 {dimension_numbers = #tpu.dot_dimension_numbers<[1], [0], [0], [1], [0, 0, 1, 1], [], []>} : vector<8x8xf32>, vector<8x8xf32>, vector<8x8xf32> -> vector<8x8xf32>
    %64 = arith.addf %63, %4 : vector<8x8xf32>
    %cst_27 = arith.constant dense<0xFF800000> : vector<8xf32>
    %65 = vector.multi_reduction <maximumf>, %64, %cst_27 [1] : vector<8x8xf32> to vector<8xf32>
    %66 = vector.shape_cast %65 : vector<8xf32> to vector<8x1xf32>
    %67 = vector.broadcast %66 : vector<8x1xf32> to vector<8x8xf32>
    %68 = arith.subf %64, %67 : vector<8x8xf32>
    %69 = math.exp %68 : vector<8x8xf32>
    %cst_28 = arith.constant dense<0.000000e+00> : vector<8xf32>
    %70 = vector.multi_reduction <add>, %69, %cst_28 [1] : vector<8x8xf32> to vector<8xf32>
    %71 = vector.shape_cast %70 : vector<8xf32> to vector<8x1xf32>
    %72 = tpu.reciprocal %71 : vector<8x1xf32> -> vector<8x1xf32>
    %73 = vector.broadcast %72 : vector<8x1xf32> to vector<8x8xf32>
    %74 = arith.mulf %69, %73 : vector<8x8xf32>
    %75 = vector.extract_strided_slice %40 {offsets = [0, 8], sizes = [8, 8], strides = [1, 1]} : vector<8x32xf32> to vector<8x8xf32>
    %cst_29 = arith.constant dense<0.000000e+00> : vector<8x8xf32>
    %76 = tpu.matmul %74, %75, %cst_29 {dimension_numbers = #tpu.dot_dimension_numbers<[1], [0], [0], [1], [0, 0, 1, 1], [], []>} : vector<8x8xf32>, vector<8x8xf32>, vector<8x8xf32> -> vector<8x8xf32>
    %77 = vector.extract_strided_slice %8 {offsets = [8, 0], sizes = [8, 32], strides = [1, 1]} : vector<32x32xf32> to vector<8x32xf32>
    %cst_30 = arith.constant dense<0.000000e+00> : vector<8x32xf32>
    %78 = tpu.matmul %76, %77, %cst_30 {dimension_numbers = #tpu.dot_dimension_numbers<[1], [0], [0], [1], [0, 0, 1, 1], [], []>} : vector<8x8xf32>, vector<8x32xf32>, vector<8x32xf32> -> vector<8x32xf32>
    %79 = arith.addf %59, %78 : vector<8x32xf32>
    %80 = vector.extract_strided_slice %38 {offsets = [0, 16], sizes = [8, 8], strides = [1, 1]} : vector<8x32xf32> to vector<8x8xf32>
    %81 = vector.extract_strided_slice %39 {offsets = [0, 16], sizes = [8, 8], strides = [1, 1]} : vector<8x32xf32> to vector<8x8xf32>
    %82 = tpu.transpose %81, [1, 0] : vector<8x8xf32> -> vector<8x8xf32>
    %cst_31 = arith.constant dense<0.000000e+00> : vector<8x8xf32>
    %83 = tpu.matmul %80, %82, %cst_31 {dimension_numbers = #tpu.dot_dimension_numbers<[1], [0], [0], [1], [0, 0, 1, 1], [], []>} : vector<8x8xf32>, vector<8x8xf32>, vector<8x8xf32> -> vector<8x8xf32>
    %84 = arith.addf %83, %4 : vector<8x8xf32>
    %cst_32 = arith.constant dense<0xFF800000> : vector<8xf32>
    %85 = vector.multi_reduction <maximumf>, %84, %cst_32 [1] : vector<8x8xf32> to vector<8xf32>
    %86 = vector.shape_cast %85 : vector<8xf32> to vector<8x1xf32>
    %87 = vector.broadcast %86 : vector<8x1xf32> to vector<8x8xf32>
    %88 = arith.subf %84, %87 : vector<8x8xf32>
    %89 = math.exp %88 : vector<8x8xf32>
    %cst_33 = arith.constant dense<0.000000e+00> : vector<8xf32>
    %90 = vector.multi_reduction <add>, %89, %cst_33 [1] : vector<8x8xf32> to vector<8xf32>
    %91 = vector.shape_cast %90 : vector<8xf32> to vector<8x1xf32>
    %92 = tpu.reciprocal %91 : vector<8x1xf32> -> vector<8x1xf32>
    %93 = vector.broadcast %92 : vector<8x1xf32> to vector<8x8xf32>
    %94 = arith.mulf %89, %93 : vector<8x8xf32>
    %95 = vector.extract_strided_slice %40 {offsets = [0, 16], sizes = [8, 8], strides = [1, 1]} : vector<8x32xf32> to vector<8x8xf32>
    %cst_34 = arith.constant dense<0.000000e+00> : vector<8x8xf32>
    %96 = tpu.matmul %94, %95, %cst_34 {dimension_numbers = #tpu.dot_dimension_numbers<[1], [0], [0], [1], [0, 0, 1, 1], [], []>} : vector<8x8xf32>, vector<8x8xf32>, vector<8x8xf32> -> vector<8x8xf32>
    %97 = vector.extract_strided_slice %8 {offsets = [16, 0], sizes = [8, 32], strides = [1, 1]} : vector<32x32xf32> to vector<8x32xf32>
    %cst_35 = arith.constant dense<0.000000e+00> : vector<8x32xf32>
    %98 = tpu.matmul %96, %97, %cst_35 {dimension_numbers = #tpu.dot_dimension_numbers<[1], [0], [0], [1], [0, 0, 1, 1], [], []>} : vector<8x8xf32>, vector<8x32xf32>, vector<8x32xf32> -> vector<8x32xf32>
    %99 = arith.addf %79, %98 : vector<8x32xf32>
    %100 = vector.extract_strided_slice %38 {offsets = [0, 24], sizes = [8, 8], strides = [1, 1]} : vector<8x32xf32> to vector<8x8xf32>
    %101 = vector.extract_strided_slice %39 {offsets = [0, 24], sizes = [8, 8], strides = [1, 1]} : vector<8x32xf32> to vector<8x8xf32>
    %102 = tpu.transpose %101, [1, 0] : vector<8x8xf32> -> vector<8x8xf32>
    %cst_36 = arith.constant dense<0.000000e+00> : vector<8x8xf32>
    %103 = tpu.matmul %100, %102, %cst_36 {dimension_numbers = #tpu.dot_dimension_numbers<[1], [0], [0], [1], [0, 0, 1, 1], [], []>} : vector<8x8xf32>, vector<8x8xf32>, vector<8x8xf32> -> vector<8x8xf32>
    %104 = arith.addf %103, %4 : vector<8x8xf32>
    %cst_37 = arith.constant dense<0xFF800000> : vector<8xf32>
    %105 = vector.multi_reduction <maximumf>, %104, %cst_37 [1] : vector<8x8xf32> to vector<8xf32>
    %106 = vector.shape_cast %105 : vector<8xf32> to vector<8x1xf32>
    %107 = vector.broadcast %106 : vector<8x1xf32> to vector<8x8xf32>
    %108 = arith.subf %104, %107 : vector<8x8xf32>
    %109 = math.exp %108 : vector<8x8xf32>
    %cst_38 = arith.constant dense<0.000000e+00> : vector<8xf32>
    %110 = vector.multi_reduction <add>, %109, %cst_38 [1] : vector<8x8xf32> to vector<8xf32>
    %111 = vector.shape_cast %110 : vector<8xf32> to vector<8x1xf32>
    %112 = tpu.reciprocal %111 : vector<8x1xf32> -> vector<8x1xf32>
    %113 = vector.broadcast %112 : vector<8x1xf32> to vector<8x8xf32>
    %114 = arith.mulf %109, %113 : vector<8x8xf32>
    %115 = vector.extract_strided_slice %40 {offsets = [0, 24], sizes = [8, 8], strides = [1, 1]} : vector<8x32xf32> to vector<8x8xf32>
    %cst_39 = arith.constant dense<0.000000e+00> : vector<8x8xf32>
    %116 = tpu.matmul %114, %115, %cst_39 {dimension_numbers = #tpu.dot_dimension_numbers<[1], [0], [0], [1], [0, 0, 1, 1], [], []>} : vector<8x8xf32>, vector<8x8xf32>, vector<8x8xf32> -> vector<8x8xf32>
    %117 = vector.extract_strided_slice %8 {offsets = [24, 0], sizes = [8, 32], strides = [1, 1]} : vector<32x32xf32> to vector<8x32xf32>
    %cst_40 = arith.constant dense<0.000000e+00> : vector<8x32xf32>
    %118 = tpu.matmul %116, %117, %cst_40 {dimension_numbers = #tpu.dot_dimension_numbers<[1], [0], [0], [1], [0, 0, 1, 1], [], []>} : vector<8x8xf32>, vector<8x32xf32>, vector<8x32xf32> -> vector<8x32xf32>
    %119 = arith.addf %99, %118 : vector<8x32xf32>
    %120 = vector.extract_strided_slice %37 {offsets = [8, 0], sizes = [8, 32], strides = [1, 1]} : vector<16x96xf32> to vector<8x32xf32>
    %121 = vector.extract_strided_slice %37 {offsets = [8, 32], sizes = [8, 32], strides = [1, 1]} : vector<16x96xf32> to vector<8x32xf32>
    %122 = vector.extract_strided_slice %37 {offsets = [8, 64], sizes = [8, 32], strides = [1, 1]} : vector<16x96xf32> to vector<8x32xf32>
    %123 = vector.extract_strided_slice %120 {offsets = [0, 0], sizes = [8, 8], strides = [1, 1]} : vector<8x32xf32> to vector<8x8xf32>
    %124 = vector.extract_strided_slice %121 {offsets = [0, 0], sizes = [8, 8], strides = [1, 1]} : vector<8x32xf32> to vector<8x8xf32>
    %125 = tpu.transpose %124, [1, 0] : vector<8x8xf32> -> vector<8x8xf32>
    %cst_41 = arith.constant dense<0.000000e+00> : vector<8x8xf32>
    %126 = tpu.matmul %123, %125, %cst_41 {dimension_numbers = #tpu.dot_dimension_numbers<[1], [0], [0], [1], [0, 0, 1, 1], [], []>} : vector<8x8xf32>, vector<8x8xf32>, vector<8x8xf32> -> vector<8x8xf32>
    %127 = arith.addf %126, %4 : vector<8x8xf32>
    %cst_42 = arith.constant dense<0xFF800000> : vector<8xf32>
    %128 = vector.multi_reduction <maximumf>, %127, %cst_42 [1] : vector<8x8xf32> to vector<8xf32>
    %129 = vector.shape_cast %128 : vector<8xf32> to vector<8x1xf32>
    %130 = vector.broadcast %129 : vector<8x1xf32> to vector<8x8xf32>
    %131 = arith.subf %127, %130 : vector<8x8xf32>
    %132 = math.exp %131 : vector<8x8xf32>
    %cst_43 = arith.constant dense<0.000000e+00> : vector<8xf32>
    %133 = vector.multi_reduction <add>, %132, %cst_43 [1] : vector<8x8xf32> to vector<8xf32>
    %134 = vector.shape_cast %133 : vector<8xf32> to vector<8x1xf32>
    %135 = tpu.reciprocal %134 : vector<8x1xf32> -> vector<8x1xf32>
    %136 = vector.broadcast %135 : vector<8x1xf32> to vector<8x8xf32>
    %137 = arith.mulf %132, %136 : vector<8x8xf32>
    %138 = vector.extract_strided_slice %122 {offsets = [0, 0], sizes = [8, 8], strides = [1, 1]} : vector<8x32xf32> to vector<8x8xf32>
    %cst_44 = arith.constant dense<0.000000e+00> : vector<8x8xf32>
    %139 = tpu.matmul %137, %138, %cst_44 {dimension_numbers = #tpu.dot_dimension_numbers<[1], [0], [0], [1], [0, 0, 1, 1], [], []>} : vector<8x8xf32>, vector<8x8xf32>, vector<8x8xf32> -> vector<8x8xf32>
    %140 = vector.extract_strided_slice %8 {offsets = [0, 0], sizes = [8, 32], strides = [1, 1]} : vector<32x32xf32> to vector<8x32xf32>
    %cst_45 = arith.constant dense<0.000000e+00> : vector<8x32xf32>
    %141 = tpu.matmul %139, %140, %cst_45 {dimension_numbers = #tpu.dot_dimension_numbers<[1], [0], [0], [1], [0, 0, 1, 1], [], []>} : vector<8x8xf32>, vector<8x32xf32>, vector<8x32xf32> -> vector<8x32xf32>
    %142 = vector.extract_strided_slice %120 {offsets = [0, 8], sizes = [8, 8], strides = [1, 1]} : vector<8x32xf32> to vector<8x8xf32>
    %143 = vector.extract_strided_slice %121 {offsets = [0, 8], sizes = [8, 8], strides = [1, 1]} : vector<8x32xf32> to vector<8x8xf32>
    %144 = tpu.transpose %143, [1, 0] : vector<8x8xf32> -> vector<8x8xf32>
    %cst_46 = arith.constant dense<0.000000e+00> : vector<8x8xf32>
    %145 = tpu.matmul %142, %144, %cst_46 {dimension_numbers = #tpu.dot_dimension_numbers<[1], [0], [0], [1], [0, 0, 1, 1], [], []>} : vector<8x8xf32>, vector<8x8xf32>, vector<8x8xf32> -> vector<8x8xf32>
    %146 = arith.addf %145, %4 : vector<8x8xf32>
    %cst_47 = arith.constant dense<0xFF800000> : vector<8xf32>
    %147 = vector.multi_reduction <maximumf>, %146, %cst_47 [1] : vector<8x8xf32> to vector<8xf32>
    %148 = vector.shape_cast %147 : vector<8xf32> to vector<8x1xf32>
    %149 = vector.broadcast %148 : vector<8x1xf32> to vector<8x8xf32>
    %150 = arith.subf %146, %149 : vector<8x8xf32>
    %151 = math.exp %150 : vector<8x8xf32>
    %cst_48 = arith.constant dense<0.000000e+00> : vector<8xf32>
    %152 = vector.multi_reduction <add>, %151, %cst_48 [1] : vector<8x8xf32> to vector<8xf32>
    %153 = vector.shape_cast %152 : vector<8xf32> to vector<8x1xf32>
    %154 = tpu.reciprocal %153 : vector<8x1xf32> -> vector<8x1xf32>
    %155 = vector.broadcast %154 : vector<8x1xf32> to vector<8x8xf32>
    %156 = arith.mulf %151, %155 : vector<8x8xf32>
    %157 = vector.extract_strided_slice %122 {offsets = [0, 8], sizes = [8, 8], strides = [1, 1]} : vector<8x32xf32> to vector<8x8xf32>
    %cst_49 = arith.constant dense<0.000000e+00> : vector<8x8xf32>
    %158 = tpu.matmul %156, %157, %cst_49 {dimension_numbers = #tpu.dot_dimension_numbers<[1], [0], [0], [1], [0, 0, 1, 1], [], []>} : vector<8x8xf32>, vector<8x8xf32>, vector<8x8xf32> -> vector<8x8xf32>
    %159 = vector.extract_strided_slice %8 {offsets = [8, 0], sizes = [8, 32], strides = [1, 1]} : vector<32x32xf32> to vector<8x32xf32>
    %cst_50 = arith.constant dense<0.000000e+00> : vector<8x32xf32>
    %160 = tpu.matmul %158, %159, %cst_50 {dimension_numbers = #tpu.dot_dimension_numbers<[1], [0], [0], [1], [0, 0, 1, 1], [], []>} : vector<8x8xf32>, vector<8x32xf32>, vector<8x32xf32> -> vector<8x32xf32>
    %161 = arith.addf %141, %160 : vector<8x32xf32>
    %162 = vector.extract_strided_slice %120 {offsets = [0, 16], sizes = [8, 8], strides = [1, 1]} : vector<8x32xf32> to vector<8x8xf32>
    %163 = vector.extract_strided_slice %121 {offsets = [0, 16], sizes = [8, 8], strides = [1, 1]} : vector<8x32xf32> to vector<8x8xf32>
    %164 = tpu.transpose %163, [1, 0] : vector<8x8xf32> -> vector<8x8xf32>
    %cst_51 = arith.constant dense<0.000000e+00> : vector<8x8xf32>
    %165 = tpu.matmul %162, %164, %cst_51 {dimension_numbers = #tpu.dot_dimension_numbers<[1], [0], [0], [1], [0, 0, 1, 1], [], []>} : vector<8x8xf32>, vector<8x8xf32>, vector<8x8xf32> -> vector<8x8xf32>
    %166 = arith.addf %165, %4 : vector<8x8xf32>
    %cst_52 = arith.constant dense<0xFF800000> : vector<8xf32>
    %167 = vector.multi_reduction <maximumf>, %166, %cst_52 [1] : vector<8x8xf32> to vector<8xf32>
    %168 = vector.shape_cast %167 : vector<8xf32> to vector<8x1xf32>
    %169 = vector.broadcast %168 : vector<8x1xf32> to vector<8x8xf32>
    %170 = arith.subf %166, %169 : vector<8x8xf32>
    %171 = math.exp %170 : vector<8x8xf32>
    %cst_53 = arith.constant dense<0.000000e+00> : vector<8xf32>
    %172 = vector.multi_reduction <add>, %171, %cst_53 [1] : vector<8x8xf32> to vector<8xf32>
    %173 = vector.shape_cast %172 : vector<8xf32> to vector<8x1xf32>
    %174 = tpu.reciprocal %173 : vector<8x1xf32> -> vector<8x1xf32>
    %175 = vector.broadcast %174 : vector<8x1xf32> to vector<8x8xf32>
    %176 = arith.mulf %171, %175 : vector<8x8xf32>
    %177 = vector.extract_strided_slice %122 {offsets = [0, 16], sizes = [8, 8], strides = [1, 1]} : vector<8x32xf32> to vector<8x8xf32>
    %cst_54 = arith.constant dense<0.000000e+00> : vector<8x8xf32>
    %178 = tpu.matmul %176, %177, %cst_54 {dimension_numbers = #tpu.dot_dimension_numbers<[1], [0], [0], [1], [0, 0, 1, 1], [], []>} : vector<8x8xf32>, vector<8x8xf32>, vector<8x8xf32> -> vector<8x8xf32>
    %179 = vector.extract_strided_slice %8 {offsets = [16, 0], sizes = [8, 32], strides = [1, 1]} : vector<32x32xf32> to vector<8x32xf32>
    %cst_55 = arith.constant dense<0.000000e+00> : vector<8x32xf32>
    %180 = tpu.matmul %178, %179, %cst_55 {dimension_numbers = #tpu.dot_dimension_numbers<[1], [0], [0], [1], [0, 0, 1, 1], [], []>} : vector<8x8xf32>, vector<8x32xf32>, vector<8x32xf32> -> vector<8x32xf32>
    %181 = arith.addf %161, %180 : vector<8x32xf32>
    %182 = vector.extract_strided_slice %120 {offsets = [0, 24], sizes = [8, 8], strides = [1, 1]} : vector<8x32xf32> to vector<8x8xf32>
    %183 = vector.extract_strided_slice %121 {offsets = [0, 24], sizes = [8, 8], strides = [1, 1]} : vector<8x32xf32> to vector<8x8xf32>
    %184 = tpu.transpose %183, [1, 0] : vector<8x8xf32> -> vector<8x8xf32>
    %cst_56 = arith.constant dense<0.000000e+00> : vector<8x8xf32>
    %185 = tpu.matmul %182, %184, %cst_56 {dimension_numbers = #tpu.dot_dimension_numbers<[1], [0], [0], [1], [0, 0, 1, 1], [], []>} : vector<8x8xf32>, vector<8x8xf32>, vector<8x8xf32> -> vector<8x8xf32>
    %186 = arith.addf %185, %4 : vector<8x8xf32>
    %cst_57 = arith.constant dense<0xFF800000> : vector<8xf32>
    %187 = vector.multi_reduction <maximumf>, %186, %cst_57 [1] : vector<8x8xf32> to vector<8xf32>
    %188 = vector.shape_cast %187 : vector<8xf32> to vector<8x1xf32>
    %189 = vector.broadcast %188 : vector<8x1xf32> to vector<8x8xf32>
    %190 = arith.subf %186, %189 : vector<8x8xf32>
    %191 = math.exp %190 : vector<8x8xf32>
    %cst_58 = arith.constant dense<0.000000e+00> : vector<8xf32>
    %192 = vector.multi_reduction <add>, %191, %cst_58 [1] : vector<8x8xf32> to vector<8xf32>
    %193 = vector.shape_cast %192 : vector<8xf32> to vector<8x1xf32>
    %194 = tpu.reciprocal %193 : vector<8x1xf32> -> vector<8x1xf32>
    %195 = vector.broadcast %194 : vector<8x1xf32> to vector<8x8xf32>
    %196 = arith.mulf %191, %195 : vector<8x8xf32>
    %197 = vector.extract_strided_slice %122 {offsets = [0, 24], sizes = [8, 8], strides = [1, 1]} : vector<8x32xf32> to vector<8x8xf32>
    %cst_59 = arith.constant dense<0.000000e+00> : vector<8x8xf32>
    %198 = tpu.matmul %196, %197, %cst_59 {dimension_numbers = #tpu.dot_dimension_numbers<[1], [0], [0], [1], [0, 0, 1, 1], [], []>} : vector<8x8xf32>, vector<8x8xf32>, vector<8x8xf32> -> vector<8x8xf32>
    %199 = vector.extract_strided_slice %8 {offsets = [24, 0], sizes = [8, 32], strides = [1, 1]} : vector<32x32xf32> to vector<8x32xf32>
    %cst_60 = arith.constant dense<0.000000e+00> : vector<8x32xf32>
    %200 = tpu.matmul %198, %199, %cst_60 {dimension_numbers = #tpu.dot_dimension_numbers<[1], [0], [0], [1], [0, 0, 1, 1], [], []>} : vector<8x8xf32>, vector<8x32xf32>, vector<8x32xf32> -> vector<8x32xf32>
    %201 = arith.addf %181, %200 : vector<8x32xf32>
    %202 = tpu.concatenate %119, %201 in 0 : vector<8x32xf32>, vector<8x32xf32> -> vector<16x32xf32>
    %203 = arith.addf %1, %202 : vector<16x32xf32>
    %c2 = arith.constant 2 : index
    %c0_61 = arith.constant 0 : index
    %204 = vector.load %arg6[%c2, %c0_61] : memref<8x64xf32, #tpu.memory_space<vmem>>, vector<1x32xf32>
    %c3 = arith.constant 3 : index
    %c0_62 = arith.constant 0 : index
    %205 = vector.load %arg6[%c3, %c0_62] : memref<8x64xf32, #tpu.memory_space<vmem>>, vector<1x32xf32>
    %cst_63 = arith.constant dense<0.000000e+00> : vector<16xf32>
    %206 = vector.multi_reduction <add>, %203, %cst_63 [1] : vector<16x32xf32> to vector<16xf32>
    %207 = vector.shape_cast %206 : vector<16xf32> to vector<16x1xf32>
    %cst_64 = arith.constant 3.200000e+01 : f32
    %208 = vector.broadcast %cst_64 : f32 to vector<16x1xf32>
    %209 = arith.divf %207, %208 : vector<16x1xf32>
    %210 = vector.broadcast %209 : vector<16x1xf32> to vector<16x32xf32>
    %211 = arith.subf %203, %210 : vector<16x32xf32>
    %212 = arith.mulf %211, %211 : vector<16x32xf32>
    %cst_65 = arith.constant dense<0.000000e+00> : vector<16xf32>
    %213 = vector.multi_reduction <add>, %212, %cst_65 [1] : vector<16x32xf32> to vector<16xf32>
    %214 = vector.shape_cast %213 : vector<16xf32> to vector<16x1xf32>
    %cst_66 = arith.constant 0.0322580636 : f32
    %215 = vector.broadcast %cst_66 : f32 to vector<16x1xf32>
    %216 = arith.mulf %214, %215 : vector<16x1xf32>
    %217 = math.sqrt %216 : vector<16x1xf32>
    %cst_67 = arith.constant 9.99999997E-7 : f32
    %218 = vector.broadcast %cst_67 : f32 to vector<16x1xf32>
    %219 = arith.addf %217, %218 : vector<16x1xf32>
    %220 = tpu.reciprocal %219 : vector<16x1xf32> -> vector<16x1xf32>
    %221 = vector.broadcast %220 : vector<16x1xf32> to vector<16x32xf32>
    %222 = arith.mulf %211, %221 : vector<16x32xf32>
    %223 = vector.broadcast %204 : vector<1x32xf32> to vector<16x32xf32>
    %224 = arith.mulf %223, %222 : vector<16x32xf32>
    %225 = vector.broadcast %205 : vector<1x32xf32> to vector<16x32xf32>
    %226 = arith.addf %224, %225 : vector<16x32xf32>
    %cst_68 = arith.constant dense<0.000000e+00> : vector<16x32xf32>
    %227 = tpu.matmul %226, %9, %cst_68 {dimension_numbers = #tpu.dot_dimension_numbers<[1], [0], [0], [1], [0, 0, 1, 1], [], []>} : vector<16x32xf32>, vector<32x32xf32>, vector<16x32xf32> -> vector<16x32xf32>
    %cst_69 = arith.constant dense<0.000000e+00> : vector<16x64xf32>
    %228 = tpu.matmul %3, %10, %cst_69 {dimension_numbers = #tpu.dot_dimension_numbers<[1], [0], [0], [1], [0, 0, 1, 1], [], []>} : vector<16x32xf32>, vector<32x64xf32>, vector<16x64xf32> -> vector<16x64xf32>
    %229 = vector.extract_strided_slice %227 {offsets = [0, 0], sizes = [8, 32], strides = [1, 1]} : vector<16x32xf32> to vector<8x32xf32>
    %230 = vector.extract_strided_slice %228 {offsets = [0, 0], sizes = [8, 32], strides = [1, 1]} : vector<16x64xf32> to vector<8x32xf32>
    %231 = vector.extract_strided_slice %228 {offsets = [0, 32], sizes = [8, 32], strides = [1, 1]} : vector<16x64xf32> to vector<8x32xf32>
    %232 = vector.extract_strided_slice %229 {offsets = [0, 0], sizes = [8, 8], strides = [1, 1]} : vector<8x32xf32> to vector<8x8xf32>
    %233 = vector.extract_strided_slice %230 {offsets = [0, 0], sizes = [8, 8], strides = [1, 1]} : vector<8x32xf32> to vector<8x8xf32>
    %234 = tpu.transpose %233, [1, 0] : vector<8x8xf32> -> vector<8x8xf32>
    %cst_70 = arith.constant dense<0.000000e+00> : vector<8x8xf32>
    %235 = tpu.matmul %232, %234, %cst_70 {dimension_numbers = #tpu.dot_dimension_numbers<[1], [0], [0], [1], [0, 0, 1, 1], [], []>} : vector<8x8xf32>, vector<8x8xf32>, vector<8x8xf32> -> vector<8x8xf32>
    %236 = vector.broadcast %5 : vector<1x8xf32> to vector<8x8xf32>
    %237 = arith.addf %235, %236 : vector<8x8xf32>
    %cst_71 = arith.constant dense<0xFF800000> : vector<8xf32>
    %238 = vector.multi_reduction <maximumf>, %237, %cst_71 [1] : vector<8x8xf32> to vector<8xf32>
    %239 = vector.shape_cast %238 : vector<8xf32> to vector<8x1xf32>
    %240 = vector.broadcast %239 : vector<8x1xf32> to vector<8x8xf32>
    %241 = arith.subf %237, %240 : vector<8x8xf32>
    %242 = math.exp %241 : vector<8x8xf32>
    %cst_72 = arith.constant dense<0.000000e+00> : vector<8xf32>
    %243 = vector.multi_reduction <add>, %242, %cst_72 [1] : vector<8x8xf32> to vector<8xf32>
    %244 = vector.shape_cast %243 : vector<8xf32> to vector<8x1xf32>
    %245 = tpu.reciprocal %244 : vector<8x1xf32> -> vector<8x1xf32>
    %246 = vector.broadcast %245 : vector<8x1xf32> to vector<8x8xf32>
    %247 = arith.mulf %242, %246 : vector<8x8xf32>
    %248 = vector.extract_strided_slice %231 {offsets = [0, 0], sizes = [8, 8], strides = [1, 1]} : vector<8x32xf32> to vector<8x8xf32>
    %cst_73 = arith.constant dense<0.000000e+00> : vector<8x8xf32>
    %249 = tpu.matmul %247, %248, %cst_73 {dimension_numbers = #tpu.dot_dimension_numbers<[1], [0], [0], [1], [0, 0, 1, 1], [], []>} : vector<8x8xf32>, vector<8x8xf32>, vector<8x8xf32> -> vector<8x8xf32>
    %250 = vector.extract_strided_slice %11 {offsets = [0, 0], sizes = [8, 32], strides = [1, 1]} : vector<32x32xf32> to vector<8x32xf32>
    %cst_74 = arith.constant dense<0.000000e+00> : vector<8x32xf32>
    %251 = tpu.matmul %249, %250, %cst_74 {dimension_numbers = #tpu.dot_dimension_numbers<[1], [0], [0], [1], [0, 0, 1, 1], [], []>} : vector<8x8xf32>, vector<8x32xf32>, vector<8x32xf32> -> vector<8x32xf32>
    %252 = vector.extract_strided_slice %229 {offsets = [0, 8], sizes = [8, 8], strides = [1, 1]} : vector<8x32xf32> to vector<8x8xf32>
    %253 = vector.extract_strided_slice %230 {offsets = [0, 8], sizes = [8, 8], strides = [1, 1]} : vector<8x32xf32> to vector<8x8xf32>
    %254 = tpu.transpose %253, [1, 0] : vector<8x8xf32> -> vector<8x8xf32>
    %cst_75 = arith.constant dense<0.000000e+00> : vector<8x8xf32>
    %255 = tpu.matmul %252, %254, %cst_75 {dimension_numbers = #tpu.dot_dimension_numbers<[1], [0], [0], [1], [0, 0, 1, 1], [], []>} : vector<8x8xf32>, vector<8x8xf32>, vector<8x8xf32> -> vector<8x8xf32>
    %256 = vector.broadcast %5 : vector<1x8xf32> to vector<8x8xf32>
    %257 = arith.addf %255, %256 : vector<8x8xf32>
    %cst_76 = arith.constant dense<0xFF800000> : vector<8xf32>
    %258 = vector.multi_reduction <maximumf>, %257, %cst_76 [1] : vector<8x8xf32> to vector<8xf32>
    %259 = vector.shape_cast %258 : vector<8xf32> to vector<8x1xf32>
    %260 = vector.broadcast %259 : vector<8x1xf32> to vector<8x8xf32>
    %261 = arith.subf %257, %260 : vector<8x8xf32>
    %262 = math.exp %261 : vector<8x8xf32>
    %cst_77 = arith.constant dense<0.000000e+00> : vector<8xf32>
    %263 = vector.multi_reduction <add>, %262, %cst_77 [1] : vector<8x8xf32> to vector<8xf32>
    %264 = vector.shape_cast %263 : vector<8xf32> to vector<8x1xf32>
    %265 = tpu.reciprocal %264 : vector<8x1xf32> -> vector<8x1xf32>
    %266 = vector.broadcast %265 : vector<8x1xf32> to vector<8x8xf32>
    %267 = arith.mulf %262, %266 : vector<8x8xf32>
    %268 = vector.extract_strided_slice %231 {offsets = [0, 8], sizes = [8, 8], strides = [1, 1]} : vector<8x32xf32> to vector<8x8xf32>
    %cst_78 = arith.constant dense<0.000000e+00> : vector<8x8xf32>
    %269 = tpu.matmul %267, %268, %cst_78 {dimension_numbers = #tpu.dot_dimension_numbers<[1], [0], [0], [1], [0, 0, 1, 1], [], []>} : vector<8x8xf32>, vector<8x8xf32>, vector<8x8xf32> -> vector<8x8xf32>
    %270 = vector.extract_strided_slice %11 {offsets = [8, 0], sizes = [8, 32], strides = [1, 1]} : vector<32x32xf32> to vector<8x32xf32>
    %cst_79 = arith.constant dense<0.000000e+00> : vector<8x32xf32>
    %271 = tpu.matmul %269, %270, %cst_79 {dimension_numbers = #tpu.dot_dimension_numbers<[1], [0], [0], [1], [0, 0, 1, 1], [], []>} : vector<8x8xf32>, vector<8x32xf32>, vector<8x32xf32> -> vector<8x32xf32>
    %272 = arith.addf %251, %271 : vector<8x32xf32>
    %273 = vector.extract_strided_slice %229 {offsets = [0, 16], sizes = [8, 8], strides = [1, 1]} : vector<8x32xf32> to vector<8x8xf32>
    %274 = vector.extract_strided_slice %230 {offsets = [0, 16], sizes = [8, 8], strides = [1, 1]} : vector<8x32xf32> to vector<8x8xf32>
    %275 = tpu.transpose %274, [1, 0] : vector<8x8xf32> -> vector<8x8xf32>
    %cst_80 = arith.constant dense<0.000000e+00> : vector<8x8xf32>
    %276 = tpu.matmul %273, %275, %cst_80 {dimension_numbers = #tpu.dot_dimension_numbers<[1], [0], [0], [1], [0, 0, 1, 1], [], []>} : vector<8x8xf32>, vector<8x8xf32>, vector<8x8xf32> -> vector<8x8xf32>
    %277 = vector.broadcast %5 : vector<1x8xf32> to vector<8x8xf32>
    %278 = arith.addf %276, %277 : vector<8x8xf32>
    %cst_81 = arith.constant dense<0xFF800000> : vector<8xf32>
    %279 = vector.multi_reduction <maximumf>, %278, %cst_81 [1] : vector<8x8xf32> to vector<8xf32>
    %280 = vector.shape_cast %279 : vector<8xf32> to vector<8x1xf32>
    %281 = vector.broadcast %280 : vector<8x1xf32> to vector<8x8xf32>
    %282 = arith.subf %278, %281 : vector<8x8xf32>
    %283 = math.exp %282 : vector<8x8xf32>
    %cst_82 = arith.constant dense<0.000000e+00> : vector<8xf32>
    %284 = vector.multi_reduction <add>, %283, %cst_82 [1] : vector<8x8xf32> to vector<8xf32>
    %285 = vector.shape_cast %284 : vector<8xf32> to vector<8x1xf32>
    %286 = tpu.reciprocal %285 : vector<8x1xf32> -> vector<8x1xf32>
    %287 = vector.broadcast %286 : vector<8x1xf32> to vector<8x8xf32>
    %288 = arith.mulf %283, %287 : vector<8x8xf32>
    %289 = vector.extract_strided_slice %231 {offsets = [0, 16], sizes = [8, 8], strides = [1, 1]} : vector<8x32xf32> to vector<8x8xf32>
    %cst_83 = arith.constant dense<0.000000e+00> : vector<8x8xf32>
    %290 = tpu.matmul %288, %289, %cst_83 {dimension_numbers = #tpu.dot_dimension_numbers<[1], [0], [0], [1], [0, 0, 1, 1], [], []>} : vector<8x8xf32>, vector<8x8xf32>, vector<8x8xf32> -> vector<8x8xf32>
    %291 = vector.extract_strided_slice %11 {offsets = [16, 0], sizes = [8, 32], strides = [1, 1]} : vector<32x32xf32> to vector<8x32xf32>
    %cst_84 = arith.constant dense<0.000000e+00> : vector<8x32xf32>
    %292 = tpu.matmul %290, %291, %cst_84 {dimension_numbers = #tpu.dot_dimension_numbers<[1], [0], [0], [1], [0, 0, 1, 1], [], []>} : vector<8x8xf32>, vector<8x32xf32>, vector<8x32xf32> -> vector<8x32xf32>
    %293 = arith.addf %272, %292 : vector<8x32xf32>
    %294 = vector.extract_strided_slice %229 {offsets = [0, 24], sizes = [8, 8], strides = [1, 1]} : vector<8x32xf32> to vector<8x8xf32>
    %295 = vector.extract_strided_slice %230 {offsets = [0, 24], sizes = [8, 8], strides = [1, 1]} : vector<8x32xf32> to vector<8x8xf32>
    %296 = tpu.transpose %295, [1, 0] : vector<8x8xf32> -> vector<8x8xf32>
    %cst_85 = arith.constant dense<0.000000e+00> : vector<8x8xf32>
    %297 = tpu.matmul %294, %296, %cst_85 {dimension_numbers = #tpu.dot_dimension_numbers<[1], [0], [0], [1], [0, 0, 1, 1], [], []>} : vector<8x8xf32>, vector<8x8xf32>, vector<8x8xf32> -> vector<8x8xf32>
    %298 = vector.broadcast %5 : vector<1x8xf32> to vector<8x8xf32>
    %299 = arith.addf %297, %298 : vector<8x8xf32>
    %cst_86 = arith.constant dense<0xFF800000> : vector<8xf32>
    %300 = vector.multi_reduction <maximumf>, %299, %cst_86 [1] : vector<8x8xf32> to vector<8xf32>
    %301 = vector.shape_cast %300 : vector<8xf32> to vector<8x1xf32>
    %302 = vector.broadcast %301 : vector<8x1xf32> to vector<8x8xf32>
    %303 = arith.subf %299, %302 : vector<8x8xf32>
    %304 = math.exp %303 : vector<8x8xf32>
    %cst_87 = arith.constant dense<0.000000e+00> : vector<8xf32>
    %305 = vector.multi_reduction <add>, %304, %cst_87 [1] : vector<8x8xf32> to vector<8xf32>
    %306 = vector.shape_cast %305 : vector<8xf32> to vector<8x1xf32>
    %307 = tpu.reciprocal %306 : vector<8x1xf32> -> vector<8x1xf32>
    %308 = vector.broadcast %307 : vector<8x1xf32> to vector<8x8xf32>
    %309 = arith.mulf %304, %308 : vector<8x8xf32>
    %310 = vector.extract_strided_slice %231 {offsets = [0, 24], sizes = [8, 8], strides = [1, 1]} : vector<8x32xf32> to vector<8x8xf32>
    %cst_88 = arith.constant dense<0.000000e+00> : vector<8x8xf32>
    %311 = tpu.matmul %309, %310, %cst_88 {dimension_numbers = #tpu.dot_dimension_numbers<[1], [0], [0], [1], [0, 0, 1, 1], [], []>} : vector<8x8xf32>, vector<8x8xf32>, vector<8x8xf32> -> vector<8x8xf32>
    %312 = vector.extract_strided_slice %11 {offsets = [24, 0], sizes = [8, 32], strides = [1, 1]} : vector<32x32xf32> to vector<8x32xf32>
    %cst_89 = arith.constant dense<0.000000e+00> : vector<8x32xf32>
    %313 = tpu.matmul %311, %312, %cst_89 {dimension_numbers = #tpu.dot_dimension_numbers<[1], [0], [0], [1], [0, 0, 1, 1], [], []>} : vector<8x8xf32>, vector<8x32xf32>, vector<8x32xf32> -> vector<8x32xf32>
    %314 = arith.addf %293, %313 : vector<8x32xf32>
    %315 = vector.extract_strided_slice %227 {offsets = [8, 0], sizes = [8, 32], strides = [1, 1]} : vector<16x32xf32> to vector<8x32xf32>
    %316 = vector.extract_strided_slice %228 {offsets = [8, 0], sizes = [8, 32], strides = [1, 1]} : vector<16x64xf32> to vector<8x32xf32>
    %317 = vector.extract_strided_slice %228 {offsets = [8, 32], sizes = [8, 32], strides = [1, 1]} : vector<16x64xf32> to vector<8x32xf32>
    %318 = vector.extract_strided_slice %315 {offsets = [0, 0], sizes = [8, 8], strides = [1, 1]} : vector<8x32xf32> to vector<8x8xf32>
    %319 = vector.extract_strided_slice %316 {offsets = [0, 0], sizes = [8, 8], strides = [1, 1]} : vector<8x32xf32> to vector<8x8xf32>
    %320 = tpu.transpose %319, [1, 0] : vector<8x8xf32> -> vector<8x8xf32>
    %cst_90 = arith.constant dense<0.000000e+00> : vector<8x8xf32>
    %321 = tpu.matmul %318, %320, %cst_90 {dimension_numbers = #tpu.dot_dimension_numbers<[1], [0], [0], [1], [0, 0, 1, 1], [], []>} : vector<8x8xf32>, vector<8x8xf32>, vector<8x8xf32> -> vector<8x8xf32>
    %322 = vector.broadcast %5 : vector<1x8xf32> to vector<8x8xf32>
    %323 = arith.addf %321, %322 : vector<8x8xf32>
    %cst_91 = arith.constant dense<0xFF800000> : vector<8xf32>
    %324 = vector.multi_reduction <maximumf>, %323, %cst_91 [1] : vector<8x8xf32> to vector<8xf32>
    %325 = vector.shape_cast %324 : vector<8xf32> to vector<8x1xf32>
    %326 = vector.broadcast %325 : vector<8x1xf32> to vector<8x8xf32>
    %327 = arith.subf %323, %326 : vector<8x8xf32>
    %328 = math.exp %327 : vector<8x8xf32>
    %cst_92 = arith.constant dense<0.000000e+00> : vector<8xf32>
    %329 = vector.multi_reduction <add>, %328, %cst_92 [1] : vector<8x8xf32> to vector<8xf32>
    %330 = vector.shape_cast %329 : vector<8xf32> to vector<8x1xf32>
    %331 = tpu.reciprocal %330 : vector<8x1xf32> -> vector<8x1xf32>
    %332 = vector.broadcast %331 : vector<8x1xf32> to vector<8x8xf32>
    %333 = arith.mulf %328, %332 : vector<8x8xf32>
    %334 = vector.extract_strided_slice %317 {offsets = [0, 0], sizes = [8, 8], strides = [1, 1]} : vector<8x32xf32> to vector<8x8xf32>
    %cst_93 = arith.constant dense<0.000000e+00> : vector<8x8xf32>
    %335 = tpu.matmul %333, %334, %cst_93 {dimension_numbers = #tpu.dot_dimension_numbers<[1], [0], [0], [1], [0, 0, 1, 1], [], []>} : vector<8x8xf32>, vector<8x8xf32>, vector<8x8xf32> -> vector<8x8xf32>
    %336 = vector.extract_strided_slice %11 {offsets = [0, 0], sizes = [8, 32], strides = [1, 1]} : vector<32x32xf32> to vector<8x32xf32>
    %cst_94 = arith.constant dense<0.000000e+00> : vector<8x32xf32>
    %337 = tpu.matmul %335, %336, %cst_94 {dimension_numbers = #tpu.dot_dimension_numbers<[1], [0], [0], [1], [0, 0, 1, 1], [], []>} : vector<8x8xf32>, vector<8x32xf32>, vector<8x32xf32> -> vector<8x32xf32>
    %338 = vector.extract_strided_slice %315 {offsets = [0, 8], sizes = [8, 8], strides = [1, 1]} : vector<8x32xf32> to vector<8x8xf32>
    %339 = vector.extract_strided_slice %316 {offsets = [0, 8], sizes = [8, 8], strides = [1, 1]} : vector<8x32xf32> to vector<8x8xf32>
    %340 = tpu.transpose %339, [1, 0] : vector<8x8xf32> -> vector<8x8xf32>
    %cst_95 = arith.constant dense<0.000000e+00> : vector<8x8xf32>
    %341 = tpu.matmul %338, %340, %cst_95 {dimension_numbers = #tpu.dot_dimension_numbers<[1], [0], [0], [1], [0, 0, 1, 1], [], []>} : vector<8x8xf32>, vector<8x8xf32>, vector<8x8xf32> -> vector<8x8xf32>
    %342 = vector.broadcast %5 : vector<1x8xf32> to vector<8x8xf32>
    %343 = arith.addf %341, %342 : vector<8x8xf32>
    %cst_96 = arith.constant dense<0xFF800000> : vector<8xf32>
    %344 = vector.multi_reduction <maximumf>, %343, %cst_96 [1] : vector<8x8xf32> to vector<8xf32>
    %345 = vector.shape_cast %344 : vector<8xf32> to vector<8x1xf32>
    %346 = vector.broadcast %345 : vector<8x1xf32> to vector<8x8xf32>
    %347 = arith.subf %343, %346 : vector<8x8xf32>
    %348 = math.exp %347 : vector<8x8xf32>
    %cst_97 = arith.constant dense<0.000000e+00> : vector<8xf32>
    %349 = vector.multi_reduction <add>, %348, %cst_97 [1] : vector<8x8xf32> to vector<8xf32>
    %350 = vector.shape_cast %349 : vector<8xf32> to vector<8x1xf32>
    %351 = tpu.reciprocal %350 : vector<8x1xf32> -> vector<8x1xf32>
    %352 = vector.broadcast %351 : vector<8x1xf32> to vector<8x8xf32>
    %353 = arith.mulf %348, %352 : vector<8x8xf32>
    %354 = vector.extract_strided_slice %317 {offsets = [0, 8], sizes = [8, 8], strides = [1, 1]} : vector<8x32xf32> to vector<8x8xf32>
    %cst_98 = arith.constant dense<0.000000e+00> : vector<8x8xf32>
    %355 = tpu.matmul %353, %354, %cst_98 {dimension_numbers = #tpu.dot_dimension_numbers<[1], [0], [0], [1], [0, 0, 1, 1], [], []>} : vector<8x8xf32>, vector<8x8xf32>, vector<8x8xf32> -> vector<8x8xf32>
    %356 = vector.extract_strided_slice %11 {offsets = [8, 0], sizes = [8, 32], strides = [1, 1]} : vector<32x32xf32> to vector<8x32xf32>
    %cst_99 = arith.constant dense<0.000000e+00> : vector<8x32xf32>
    %357 = tpu.matmul %355, %356, %cst_99 {dimension_numbers = #tpu.dot_dimension_numbers<[1], [0], [0], [1], [0, 0, 1, 1], [], []>} : vector<8x8xf32>, vector<8x32xf32>, vector<8x32xf32> -> vector<8x32xf32>
    %358 = arith.addf %337, %357 : vector<8x32xf32>
    %359 = vector.extract_strided_slice %315 {offsets = [0, 16], sizes = [8, 8], strides = [1, 1]} : vector<8x32xf32> to vector<8x8xf32>
    %360 = vector.extract_strided_slice %316 {offsets = [0, 16], sizes = [8, 8], strides = [1, 1]} : vector<8x32xf32> to vector<8x8xf32>
    %361 = tpu.transpose %360, [1, 0] : vector<8x8xf32> -> vector<8x8xf32>
    %cst_100 = arith.constant dense<0.000000e+00> : vector<8x8xf32>
    %362 = tpu.matmul %359, %361, %cst_100 {dimension_numbers = #tpu.dot_dimension_numbers<[1], [0], [0], [1], [0, 0, 1, 1], [], []>} : vector<8x8xf32>, vector<8x8xf32>, vector<8x8xf32> -> vector<8x8xf32>
    %363 = vector.broadcast %5 : vector<1x8xf32> to vector<8x8xf32>
    %364 = arith.addf %362, %363 : vector<8x8xf32>
    %cst_101 = arith.constant dense<0xFF800000> : vector<8xf32>
    %365 = vector.multi_reduction <maximumf>, %364, %cst_101 [1] : vector<8x8xf32> to vector<8xf32>
    %366 = vector.shape_cast %365 : vector<8xf32> to vector<8x1xf32>
    %367 = vector.broadcast %366 : vector<8x1xf32> to vector<8x8xf32>
    %368 = arith.subf %364, %367 : vector<8x8xf32>
    %369 = math.exp %368 : vector<8x8xf32>
    %cst_102 = arith.constant dense<0.000000e+00> : vector<8xf32>
    %370 = vector.multi_reduction <add>, %369, %cst_102 [1] : vector<8x8xf32> to vector<8xf32>
    %371 = vector.shape_cast %370 : vector<8xf32> to vector<8x1xf32>
    %372 = tpu.reciprocal %371 : vector<8x1xf32> -> vector<8x1xf32>
    %373 = vector.broadcast %372 : vector<8x1xf32> to vector<8x8xf32>
    %374 = arith.mulf %369, %373 : vector<8x8xf32>
    %375 = vector.extract_strided_slice %317 {offsets = [0, 16], sizes = [8, 8], strides = [1, 1]} : vector<8x32xf32> to vector<8x8xf32>
    %cst_103 = arith.constant dense<0.000000e+00> : vector<8x8xf32>
    %376 = tpu.matmul %374, %375, %cst_103 {dimension_numbers = #tpu.dot_dimension_numbers<[1], [0], [0], [1], [0, 0, 1, 1], [], []>} : vector<8x8xf32>, vector<8x8xf32>, vector<8x8xf32> -> vector<8x8xf32>
    %377 = vector.extract_strided_slice %11 {offsets = [16, 0], sizes = [8, 32], strides = [1, 1]} : vector<32x32xf32> to vector<8x32xf32>
    %cst_104 = arith.constant dense<0.000000e+00> : vector<8x32xf32>
    %378 = tpu.matmul %376, %377, %cst_104 {dimension_numbers = #tpu.dot_dimension_numbers<[1], [0], [0], [1], [0, 0, 1, 1], [], []>} : vector<8x8xf32>, vector<8x32xf32>, vector<8x32xf32> -> vector<8x32xf32>
    %379 = arith.addf %358, %378 : vector<8x32xf32>
    %380 = vector.extract_strided_slice %315 {offsets = [0, 24], sizes = [8, 8], strides = [1, 1]} : vector<8x32xf32> to vector<8x8xf32>
    %381 = vector.extract_strided_slice %316 {offsets = [0, 24], sizes = [8, 8], strides = [1, 1]} : vector<8x32xf32> to vector<8x8xf32>
    %382 = tpu.transpose %381, [1, 0] : vector<8x8xf32> -> vector<8x8xf32>
    %cst_105 = arith.constant dense<0.000000e+00> : vector<8x8xf32>
    %383 = tpu.matmul %380, %382, %cst_105 {dimension_numbers = #tpu.dot_dimension_numbers<[1], [0], [0], [1], [0, 0, 1, 1], [], []>} : vector<8x8xf32>, vector<8x8xf32>, vector<8x8xf32> -> vector<8x8xf32>
    %384 = vector.broadcast %5 : vector<1x8xf32> to vector<8x8xf32>
    %385 = arith.addf %383, %384 : vector<8x8xf32>
    %cst_106 = arith.constant dense<0xFF800000> : vector<8xf32>
    %386 = vector.multi_reduction <maximumf>, %385, %cst_106 [1] : vector<8x8xf32> to vector<8xf32>
    %387 = vector.shape_cast %386 : vector<8xf32> to vector<8x1xf32>
    %388 = vector.broadcast %387 : vector<8x1xf32> to vector<8x8xf32>
    %389 = arith.subf %385, %388 : vector<8x8xf32>
    %390 = math.exp %389 : vector<8x8xf32>
    %cst_107 = arith.constant dense<0.000000e+00> : vector<8xf32>
    %391 = vector.multi_reduction <add>, %390, %cst_107 [1] : vector<8x8xf32> to vector<8xf32>
    %392 = vector.shape_cast %391 : vector<8xf32> to vector<8x1xf32>
    %393 = tpu.reciprocal %392 : vector<8x1xf32> -> vector<8x1xf32>
    %394 = vector.broadcast %393 : vector<8x1xf32> to vector<8x8xf32>
    %395 = arith.mulf %390, %394 : vector<8x8xf32>
    %396 = vector.extract_strided_slice %317 {offsets = [0, 24], sizes = [8, 8], strides = [1, 1]} : vector<8x32xf32> to vector<8x8xf32>
    %cst_108 = arith.constant dense<0.000000e+00> : vector<8x8xf32>
    %397 = tpu.matmul %395, %396, %cst_108 {dimension_numbers = #tpu.dot_dimension_numbers<[1], [0], [0], [1], [0, 0, 1, 1], [], []>} : vector<8x8xf32>, vector<8x8xf32>, vector<8x8xf32> -> vector<8x8xf32>
    %398 = vector.extract_strided_slice %11 {offsets = [24, 0], sizes = [8, 32], strides = [1, 1]} : vector<32x32xf32> to vector<8x32xf32>
    %cst_109 = arith.constant dense<0.000000e+00> : vector<8x32xf32>
    %399 = tpu.matmul %397, %398, %cst_109 {dimension_numbers = #tpu.dot_dimension_numbers<[1], [0], [0], [1], [0, 0, 1, 1], [], []>} : vector<8x8xf32>, vector<8x32xf32>, vector<8x32xf32> -> vector<8x32xf32>
    %400 = arith.addf %379, %399 : vector<8x32xf32>
    %401 = tpu.concatenate %314, %400 in 0 : vector<8x32xf32>, vector<8x32xf32> -> vector<16x32xf32>
    %402 = arith.addf %203, %401 : vector<16x32xf32>
    %c4 = arith.constant 4 : index
    %c0_110 = arith.constant 0 : index
    %403 = vector.load %arg6[%c4, %c0_110] : memref<8x64xf32, #tpu.memory_space<vmem>>, vector<1x32xf32>
    %c5 = arith.constant 5 : index
    %c0_111 = arith.constant 0 : index
    %404 = vector.load %arg6[%c5, %c0_111] : memref<8x64xf32, #tpu.memory_space<vmem>>, vector<1x32xf32>
    %cst_112 = arith.constant dense<0.000000e+00> : vector<16xf32>
    %405 = vector.multi_reduction <add>, %402, %cst_112 [1] : vector<16x32xf32> to vector<16xf32>
    %406 = vector.shape_cast %405 : vector<16xf32> to vector<16x1xf32>
    %cst_113 = arith.constant 3.200000e+01 : f32
    %407 = vector.broadcast %cst_113 : f32 to vector<16x1xf32>
    %408 = arith.divf %406, %407 : vector<16x1xf32>
    %409 = vector.broadcast %408 : vector<16x1xf32> to vector<16x32xf32>
    %410 = arith.subf %402, %409 : vector<16x32xf32>
    %411 = arith.mulf %410, %410 : vector<16x32xf32>
    %cst_114 = arith.constant dense<0.000000e+00> : vector<16xf32>
    %412 = vector.multi_reduction <add>, %411, %cst_114 [1] : vector<16x32xf32> to vector<16xf32>
    %413 = vector.shape_cast %412 : vector<16xf32> to vector<16x1xf32>
    %cst_115 = arith.constant 0.0322580636 : f32
    %414 = vector.broadcast %cst_115 : f32 to vector<16x1xf32>
    %415 = arith.mulf %413, %414 : vector<16x1xf32>
    %416 = math.sqrt %415 : vector<16x1xf32>
    %cst_116 = arith.constant 9.99999997E-7 : f32
    %417 = vector.broadcast %cst_116 : f32 to vector<16x1xf32>
    %418 = arith.addf %416, %417 : vector<16x1xf32>
    %419 = tpu.reciprocal %418 : vector<16x1xf32> -> vector<16x1xf32>
    %420 = vector.broadcast %419 : vector<16x1xf32> to vector<16x32xf32>
    %421 = arith.mulf %410, %420 : vector<16x32xf32>
    %422 = vector.broadcast %403 : vector<1x32xf32> to vector<16x32xf32>
    %423 = arith.mulf %422, %421 : vector<16x32xf32>
    %424 = vector.broadcast %404 : vector<1x32xf32> to vector<16x32xf32>
    %425 = arith.addf %423, %424 : vector<16x32xf32>
    %cst_117 = arith.constant dense<0.000000e+00> : vector<16x64xf32>
    %426 = tpu.matmul %425, %12, %cst_117 {dimension_numbers = #tpu.dot_dimension_numbers<[1], [0], [0], [1], [0, 0, 1, 1], [], []>} : vector<16x32xf32>, vector<32x64xf32>, vector<16x64xf32> -> vector<16x64xf32>
    %c6 = arith.constant 6 : index
    %c0_118 = arith.constant 0 : index
    %427 = vector.load %arg6[%c6, %c0_118] : memref<8x64xf32, #tpu.memory_space<vmem>>, vector<1x64xf32>
    %428 = vector.broadcast %427 : vector<1x64xf32> to vector<16x64xf32>
    %429 = arith.addf %426, %428 : vector<16x64xf32>
    %cst_119 = arith.constant 0.000000e+00 : f32
    %430 = vector.broadcast %cst_119 : f32 to vector<16x64xf32>
    %431 = arith.maximumf %429, %430 : vector<16x64xf32>
    %cst_120 = arith.constant dense<0.000000e+00> : vector<16x32xf32>
    %432 = tpu.matmul %431, %13, %cst_120 {dimension_numbers = #tpu.dot_dimension_numbers<[1], [0], [0], [1], [0, 0, 1, 1], [], []>} : vector<16x64xf32>, vector<64x32xf32>, vector<16x32xf32> -> vector<16x32xf32>
    %433 = arith.addf %402, %432 : vector<16x32xf32>
    %c7 = arith.constant 7 : index
    %c0_121 = arith.constant 0 : index
    %434 = vector.load %arg6[%c7, %c0_121] : memref<8x64xf32, #tpu.memory_space<vmem>>, vector<1x32xf32>
    %435 = vector.broadcast %434 : vector<1x32xf32> to vector<16x32xf32>
    %436 = arith.addf %433, %435 : vector<16x32xf32>
    %437 = vector.shape_cast %436 : vector<16x32xf32> to vector<2x8x32xf32>
    %c0_122 = arith.constant 0 : index
    %c0_123 = arith.constant 0 : index
    %c0_124 = arith.constant 0 : index
    %438 = vector.load %arg7[%c0_122, %c0_123, %c0_124] : memref<2x8x32xf32, #tpu.memory_space<vmem>>, vector<2x8x32xf32>
    tpu.vector_store %arg7[%c0_122, %c0_123, %c0_124], %437 {strides = array<i32>} : memref<2x8x32xf32, #tpu.memory_space<vmem>>, vector<2x8x32xf32>,
    return
  }
}

</mosaic_0001>

<bundles_post_ra>
// kernel: tpu_custom_call.1
= control target key start
LH: loop header
LB: loop body
LE: loop exit
PB: predicated region body
PF: predicated region fallthrough
CT: control target
= control target key end

     0   :  { %12 = vsyncpa [#allocation3], 0  ;;  %s5949_s0 = inlined_call_operand.hbm [shape: f32[2,8,32], index: 0, kind: input, shape index: {}]   ;;  %s5950_s1 = inlined_call_operand.hbm [shape: f32[2,8,32], index: 1, kind: input, shape index: {}]   ;;  %s5951_s2 = inlined_call_operand.hbm [shape: f32[8,8], index: 2, kind: input, shape index: {}]   ;;  %s5952_s3 = inlined_call_operand.vmem [shape: f32[1,8], index: 3, kind: input, shape index: {}]   ;;  %s5953_s4 = inlined_call_operand.vmem [shape: f32[32,320], index: 4, kind: input, shape index: {}]   ;;  %s5954_s5 = inlined_call_operand.vmem [shape: f32[64,32], index: 5, kind: input, shape index: {}]   ;;  %s5955_s6 = inlined_call_operand.vmem [shape: f32[8,64], index: 6, kind: input, shape index: {}]   ;;  %s5956_s7 = inlined_call_operand.hbm [shape: f32[2,8,32], index: 7, kind: output, shape index: {}]  }
   0x1   :  { %13 = vsyncpa [#allocation6], 0 }
   0x2   :  { %14 = vsyncpa [#allocation4], 0  ;;  %s5273_s24 = smov [#allocation5]   ;;  %s5274_s26 = smov [#allocation2]  }
   0x3   :  { %s32_s25 = sshll.u32 %s5273_s24, 4  ;;  %s20_s27 = sshll.u32 %s5274_s26, 4  ;;  %s33_s25 = int_to_ptr.vmem [resolvable:$true] %s32_s25  ;;  %s21_s27 = int_to_ptr.vmem [resolvable:$true] %s20_s27 }
   0x4   :  { %s5195_s28 = scalar_lea.vmem %s33_s25, 256  ;;  %p5200_p1 = scmp.lt.s32.totalorder %s33_s25, %s33_s25 }
   0x5   :  { %p5196_p0 = scmp.ne.s32.totalorder %s33_s25, %s5195_s28  ;;  %p5201_p2 = scmp.lt.s32.totalorder %s5195_s28, %s5195_s28 }
   0x7   :  { %p5202_p3 = por %p5201_p2, %p5200_p1 }
   0x9   :  { %p5203_p4 = pnand %p5202_p3, %p5196_p0 }
   0xb   :  { %5206 = shalt.err (!%p5203_p4)
}
   0xc   :  { %s5275_s29 = smov 128   ;;  %s5276_s30 = smov 8  }
   0xd   :  { %38 = dma.hbm_to_vmem [thread:$0]  %s5950_s1, 256, %s33_s25, [#allocation6], %s5275_s29, %s5275_s29, %s5276_s30  }
   0xe   :  { %s5215_s10 = scalar_lea.vmem %s21_s27, 256  ;;  %p5220_p6 = scmp.lt.s32.totalorder %s21_s27, %s21_s27 }
   0xf   :  { %p5216_p5 = scmp.ne.s32.totalorder %s21_s27, %s5215_s10  ;;  %p5221_p7 = scmp.lt.s32.totalorder %s5215_s10, %s5215_s10 }
  0x11   :  { %p5222_p8 = por %p5221_p7, %p5220_p6 }
  0x13   :  { %p5223_p9 = pnand %p5222_p8, %p5216_p5 }
  0x15   :  { %5226 = shalt.err (!%p5223_p9)
}
  0x16   :  { %26 = dma.hbm_to_vmem [thread:$0]  %s5949_s0, 256, %s21_s27, [#allocation3], %s5275_s29, %s5275_s29, %s5276_s30  }
  0x17   :  { %s5277_s13 = smov [#allocation7]  }
  0x18   :  { %s45_s14 = sshll.u32 %s5277_s13, 4  ;;  %s46_s14 = int_to_ptr.vmem [resolvable:$true] %s45_s14 }
  0x19   :  { %s5235_s15 = scalar_lea.vmem %s46_s14, 128  ;;  %p5240_p11 = scmp.lt.s32.totalorder %s46_s14, %s46_s14 }
  0x1a   :  { %p5236_p10 = scmp.ne.s32.totalorder %s46_s14, %s5235_s15  ;;  %p5241_p12 = scmp.lt.s32.totalorder %s5235_s15, %s5235_s15 }
  0x1c   :  { %p5242_p13 = por %p5241_p12, %p5240_p11 }
  0x1e   :  { %p5243_p0 = pnand %p5242_p13, %p5236_p10 }
  0x20   :  { %5246 = shalt.err (!%p5243_p0)
}
  0x21   :  { %48 = dma.hbm_to_vmem [thread:$0]  %s5951_s2, 128, %s46_s14, [#allocation6]  }
  0x22   :  { %5267 = dma.done.wait [#allocation3], 256  }
  0x23   :  { %5268 = vsyncadd [#allocation3], 4294967040 }
  0x24   :  { %5269 = dma.done.wait [#allocation6], 384  }
  0x25   :  { %5270 = vsyncadd [#allocation6], 4294966912  ;;  %vm94_vm0 = vcmask 261120   ;;  %v5348_v0 = vld [vmem:[#allocation2] sm:$0xff]  ;;  %v5350_v1 = vld [vmem:[#allocation2 + $0x8] sm:$0xff]  ;;  %v5278_v44 = vmov 0.0  }
  0x26   :  { %v95_v2 = vsel %vm94_vm0, %v5348_v0, 0.0  ;;  %v98_v3 = vsel %vm94_vm0, %v5350_v1, 0.0  ;;  %v5363_v14 = vld [vmem:[%s5953_s4 + $0x48] sm:$0xff]  ;;  %v5368_v15 = vld [vmem:[%s5953_s4 + $0x30] sm:$0xff]  ;;  %v5375_v16 = vld [vmem:[%s5953_s4 + $0x18] sm:$0xff]  ;;  %4792 = vmatprep.subr.mxu1 %v5278_v44  ;;  %vm5279_vm5 = vmmov 0  }
  0x27   :  { %96 = vadd.xlane.f32.xlu0 %v95_v2  ;;  %4776 = vmatprep.subr.mxu0 %v5363_v14  ;;  %v5384_v17 = vld [vmem:[%s5953_s4] sm:$0xff]  ;;  %s5280_s27 = smov 88   ;;  %s5281_s28 = smov 96   ;;  %vm232_vm6 = vcmask 64512   ;;  %vm4452_vm15 = vcmask 523264  }
  0x28   :  { %4777 = vmatpush3.msra.mxu0 %v5363_v14  ;;  %v4563_v35 = vld [vmem:[%s5955_s6] ss:$0 sm:$0xff]  ;;  %v4564_v37 = vld [vmem:[%s5955_s6 + $0x1] ss:$0 sm:$0xff]  ;;  %4794 = vmatprep.mubr.msk.f32.mxu1 %vm5279_vm5, %v5278_v44  ;;  %s5282_s8 = smov 120   ;;  %s5283_s9 = smov 64  }
  0x29   :  { %4778 = vmatprep.subr.mxu0 %v5368_v15  ;;  %v5423_v50 = vld [vmem:[#allocation7] sm:$0xff]  ;;  %s5284_s10 = smov 32   ;;  %s5285_s11 = smov 80  }
  0x2a   :  { %4779 = vmatpush3.msra.mxu0 %v5368_v15  ;;  %s5286_s12 = smov 112   ;;  %s5287_s13 = smov 48  }
  0x2b   :  { %99 = vadd.xlane.f32.xlu0 %v98_v3  ;;  %4780 = vmatprep.subr.mxu0 %v5375_v16  ;;  %s5288_s14 = smov 56   ;;  %s5289_s15 = smov 72  }
  0x2c   :  { %4781 = vmatpush3.msra.mxu0 %v5375_v16  ;;  %s5290_s1 = smov 104   ;;  %s5291_s16 = smov 40  }
  0x2d   :  { %4782 = vmatprep.subr.mxu0 %v5384_v17 }
  0x2e   :  { %4783 = vmatpush3.msra.mxu0 %v5384_v17 }
  0x2f   :  { %4787 = vmatprep.subr.mxu0 %v5278_v44 }
  0xb0   :  { %v97_v4 = vpop.xlane.xlu0 %96 }
  0xb1   :  { %v102_v5 = vmul.f32 0.03125, %v97_v4 }
  0xb3   :  { %v104_v6 = vsub.f32 %v5348_v0, %v102_v5 }
  0xb4   :  { %v100_v7 = vpop.xlane.xlu0 %99 }
  0xb5   :  { %v103_v8 = vmul.f32 0.03125, %v100_v7  ;;  %v106_v9 = vmul.f32 %v104_v6, %v104_v6 }
  0xb7   :  { %v105_v10 = vsub.f32 %v5350_v1, %v103_v8  ;;  %v108_v11 = vsel %vm94_vm0, %v106_v9, 0.0 }
  0xb8   :  { %109 = vadd.xlane.f32.xlu1 %v108_v11 }
  0xb9   :  { %v107_v12 = vmul.f32 %v105_v10, %v105_v10 }
  0xbb   :  { %v111_v13 = vsel %vm94_vm0, %v107_v12, 0.0 }
  0xbc   :  { %112 = vadd.xlane.f32.xlu1 %v111_v13 }
 0x141   :  { %v110_v18 = vpop.xlane.xlu1 %109 }
 0x142   :  { %v114_v19 = vmul.f32 0.032258064, %v110_v18 }
 0x144   :  { %5099 = vrsqrt.f32 %v114_v19  ;;  %vm118_vm1 = vcmp.eq.f32.partialorder %v114_v19, inf  ;;  %v121_v24 = vand.u32 2147483648, %v114_v19  ;;  %vm120_vm2 = vcmp.eq.f32.partialorder %v114_v19, 0.0 }
 0x145   :  { %v113_v20 = vpop.xlane.xlu1 %112 }
 0x146   :  { %v115_v21 = vmul.f32 0.032258064, %v113_v20 }
 0x148   :  { %5101 = vrsqrt.f32 %v115_v21  ;;  %vm125_vm3 = vcmp.eq.f32.partialorder %v115_v21, inf  ;;  %v128_v30 = vand.u32 2147483648, %v115_v21  ;;  %vm127_vm4 = vcmp.eq.f32.partialorder %v115_v21, 0.0 }
 0x151   :  { %v5100_v22 = vpop.eup %5099 }
 0x152   :  { %v117_v23 = vmul.f32 %v5100_v22, %v114_v19 }
 0x154   :  { %v119_v25 = vsel %vm118_vm1, %v114_v19, %v117_v23 }
 0x155   :  { %v5102_v26 = vpop.eup %5101  ;;  %v122_v27 = vsel %vm120_vm2, %v121_v24, %v119_v25 }
 0x156   :  { %v124_v28 = vmul.f32 %v5102_v26, %v115_v21  ;;  %v130_v29 = vadd.f32 1e-06, %v122_v27 }
 0x158   :  { %v126_v31 = vsel %vm125_vm3, %v115_v21, %v124_v28  ;;  %5103 = vrcp.f32 %v130_v29 }
 0x159   :  { %v129_v32 = vsel %vm127_vm4, %v128_v30, %v126_v31 }
 0x15a   :  { %v131_v33 = vadd.f32 1e-06, %v129_v32 }
 0x15c   :  { %5105 = vrcp.f32 %v131_v33 }
 0x165   :  { %v5104_v34 = vpop.eup %5103 }
 0x166   :  { %v134_v36 = vmul.f32 %v5104_v34, %v104_v6 }
 0x168   :  { %v140_v38 = vmul.f32 %v4563_v35, %v134_v36 }
 0x169   :  { %v5106_v39 = vpop.eup %5105 }
 0x16a   :  { %v135_v40 = vmul.f32 %v5106_v39, %v105_v10  ;;  %v146_v41 = vadd.f32 %v4564_v37, %v140_v38 }
 0x16c   :  { %v141_v42 = vmul.f32 %v4563_v35, %v135_v40  ;;  %4784 = vmatprep.mubr.msk.f32.mxu0 %vm94_vm0, %v146_v41 }
 0x16e   :  { %v147_v43 = vadd.f32 %v4564_v37, %v141_v42 }
 0x170   :  { %4785 = vmatmul.mubr.msk.f32.vlgmr.msra.gmra.mxu0 %vm94_vm0, %v147_v43 }
 0x171   :  { %4789 = vmatprep.mubr.msk.f32.mxu0 %vm5279_vm5, %v5278_v44 }
 0x230   :  { %v5402_v45 = vpop.f32.mrf.mxu0 }
 0x232   :  { %v5404_v46 = vpop.f32.mrf.mxu0 }
 0x233   :  { %396 = vrot.lane.b32.xlu1 %v5404_v46, %s5280_s27  ;;  %230 = vrot.lane.b32.xlu0 %v5404_v46, %s5281_s28 }
 0x237   :  { %394 = vrot.lane.b32.xlu1 %v5404_v46, %s5282_s8 }
 0x2a5   :  { %v231_v47 = vpop.permute.xlu0 %230  ;;  %v397_v48 = vpop.permute.xlu1 %396 }
 0x2a6   :  { %4788 = vmatpush3.xpose.msk.msra.mxu0 %vm232_vm6, %v231_v47 }
 0x2a7   :  { %4797 = vmatprep.subr.mxu0 %v5278_v44 }
 0x2a9   :  { %4790 = vmatmul.mubr.msk.f32.vlgmr.msra.gmra.mxu0 %vm232_vm6, %v5404_v46  ;;  %v395_v49 = vpop.permute.xlu1 %394 }
 0x2aa   :  { %4798 = vmatpush3.xpose.msk.msra.mxu0 %vm232_vm6, %v397_v48  ;;  %4799 = vmatprep.mubr.msk.f32.mxu0 %vm5279_vm5, %v5278_v44 }
 0x2ab   :  { %4807 = vmatprep.subr.mxu0 %v5278_v44 }
 0x2ad   :  { %4800 = vmatmul.mubr.msk.f32.vlgmr.msra.gmra.mxu0 %vm232_vm6, %v395_v49 }
 0x2ae   :  { %4809 = vmatprep.mubr.msk.f32.mxu0 %vm5279_vm5, %v5278_v44 }
 0x369   :  { %v303_v51 = vpop.f32.mrf.mxu0 }
 0x36a   :  { %v304_v52 = vadd.f32 %v303_v51, %v5423_v50 }
 0x36b   :  { %v4791_v53 = vpop.f32.mrf.mxu0 }
 0x36c   :  { %v307_v54 = vsel %vm232_vm6, %v304_v52, -inf }
 0x36d   :  { %308 = vmax.xlane.f32.xlu1 %v307_v54  ;;  %v468_v55 = vpop.f32.mrf.mxu0 }
 0x36e   :  { %v469_v56 = vadd.f32 %v468_v55, %v5423_v50 }
 0x36f   :  { %v4801_v57 = vpop.f32.mrf.mxu0 }
 0x370   :  { %v472_v58 = vsel %vm232_vm6, %v469_v56, -inf }
 0x371   :  { %473 = vmax.xlane.f32.xlu0 %v472_v58 }
 0x37e   :  { %318 = vrot.lane.b32.xlu1 %v5404_v46, %s5283_s9 }
 0x382   :  { %560 = vrot.lane.b32.xlu1 %v5375_v16, %s5284_s10 }
 0x386   :  { %715 = vrot.lane.b32.xlu1 %v5404_v46, %s5285_s11 }
 0x38a   :  { %713 = vrot.lane.b32.xlu1 %v5404_v46, %s5286_s12 }
 0x38e   :  { %802 = vrot.lane.b32.xlu1 %v5404_v46, %s5287_s13 }
 0x3f6   :  { %v309_v59 = vpop.xlane.xlu1 %308 }
 0x3f7   :  { %v310_v60 = vsub.f32 %v304_v52, %v309_v59 }
 0x3f9   :  { %v311_v61 = vmul.f32 1.442695, %v310_v60 }
 0x3fa   :  { %v319_v62 = vpop.permute.xlu1 %318  ;;  %v474_v63 = vpop.xlane.xlu0 %473 }
 0x3fb   :  { %5107 = vpow2.f32 %v311_v61  ;;  %v475_v2 = vsub.f32 %v469_v56, %v474_v63  ;;  %4793 = vmatpush3.msra.mxu1 %v319_v62 }
 0x3fc   :  { %4802 = vmatprep.subr.mxu1 %v5278_v44 }
 0x3fd   :  { %v476_v3 = vmul.f32 1.442695, %v475_v2 }
 0x3fe   :  { %v5440_v4 = vpop.permute.xlu1 %560 }
 0x3ff   :  { %5109 = vpow2.f32 %v476_v3  ;;  %4808 = vmatpush3.msra.mxu0 %v5440_v4 }
 0x400   :  { %4817 = vmatprep.subr.mxu0 %v5278_v44 }
 0x402   :  { %v716_v20 = vpop.permute.xlu1 %715 }
 0x406   :  { %v714_v24 = vpop.permute.xlu1 %713 }
 0x408   :  { %v5108_v5 = vpop.eup %5107 }
 0x409   :  { %v313_v6 = vsel %vm232_vm6, %v5108_v5, 0.0 }
 0x40a   :  { %314 = vadd.xlane.f32.xlu0 %v313_v6  ;;  %v803_v35 = vpop.permute.xlu1 %802 }
 0x40c   :  { %v5110_v7 = vpop.eup %5109 }
 0x40d   :  { %v478_v8 = vsel %vm232_vm6, %v5110_v7, 0.0 }
 0x40e   :  { %479 = vadd.xlane.f32.xlu0 %v478_v8 }
 0x424   :  { %483 = vrot.lane.b32.xlu0 %v5404_v46, %s5288_s14 }
 0x493   :  { %v315_v9 = vpop.xlane.xlu0 %314 }
 0x494   :  { %5111 = vrcp.f32 %v315_v9 }
 0x497   :  { %v480_v10 = vpop.xlane.xlu0 %479 }
 0x498   :  { %5113 = vrcp.f32 %v480_v10 }
 0x49b   :  { %v484_v13 = vpop.permute.xlu0 %483 }
 0x4a1   :  { %v5112_v11 = vpop.eup %5111 }
 0x4a2   :  { %v317_v12 = vmul.f32 %v5112_v11, %v5108_v5 }
 0x4a4   :  { %4795 = vmatmul.mubr.msk.f32.vlgmr.msra.gmra.mxu1 %vm232_vm6, %v317_v12 }
 0x4a5   :  { %v5114_v16 = vpop.eup %5113  ;;  %4803 = vmatpush3.msra.mxu1 %v484_v13  ;;  %4804 = vmatprep.mubr.msk.f32.mxu1 %vm5279_vm5, %v5278_v44 }
 0x4a6   :  { %v482_v18 = vmul.f32 %v5114_v16, %v5110_v7  ;;  %4812 = vmatprep.subr.mxu1 %v5278_v44 }
 0x4a8   :  { %4805 = vmatmul.mubr.msk.f32.vlgmr.msra.gmra.mxu1 %vm232_vm6, %v482_v18 }
 0x4a9   :  { %4814 = vmatprep.mubr.msk.f32.mxu1 %vm5279_vm5, %v5278_v44 }
 0x564   :  { %v390_v19 = vpop.f32.mrf.mxu1 }
 0x566   :  { %v4796_v21 = vpop.f32.mrf.mxu1 }
 0x568   :  { %v555_v22 = vpop.f32.mrf.mxu1 }
 0x569   :  { %4810 = vmatmul.mubr.msk.f32.vlgmr.msra.gmra.mxu0 %vm232_vm6, %v555_v22 }
 0x56a   :  { %4818 = vmatpush3.xpose.msk.msra.mxu0 %vm232_vm6, %v716_v20  ;;  %v4806_v23 = vpop.f32.mrf.mxu1  ;;  %4819 = vmatprep.mubr.msk.f32.mxu0 %vm5279_vm5, %v5278_v44 }
 0x56b   :  { %4827 = vmatprep.subr.mxu0 %v5278_v44 }
 0x56d   :  { %4820 = vmatmul.mubr.msk.f32.vlgmr.msra.gmra.mxu0 %vm232_vm6, %v714_v24 }
 0x56e   :  { %4829 = vmatprep.mubr.msk.f32.mxu0 %vm5279_vm5, %v5278_v44 }
 0x629   :  { %v5463_v25 = vpop.f32.mrf.mxu0 }
 0x62b   :  { %v4811_v26 = vpop.f32.mrf.mxu0 }
 0x62d   :  { %v787_v27 = vpop.f32.mrf.mxu0 }
 0x62e   :  { %v788_v28 = vadd.f32 %v787_v27, %v5423_v50 }
 0x62f   :  { %v4821_v29 = vpop.f32.mrf.mxu0 }
 0x630   :  { %v791_v30 = vsel %vm232_vm6, %v788_v28, -inf }
 0x631   :  { %792 = vmax.xlane.f32.xlu0 %v791_v30 }
 0x647   :  { %637 = vrot.lane.b32.xlu0 %v5384_v17, %s5284_s10 }
 0x64b   :  { %958 = vrot.lane.b32.xlu0 %v5404_v46, %s5289_s15 }
 0x6ba   :  { %v793_v31 = vpop.xlane.xlu0 %792 }
 0x6bb   :  { %v794_v32 = vsub.f32 %v788_v28, %v793_v31 }
 0x6bd   :  { %v795_v33 = vmul.f32 1.442695, %v794_v32 }
 0x6be   :  { %v5471_v34 = vpop.permute.xlu0 %637 }
 0x6bf   :  { %5115 = vpow2.f32 %v795_v33  ;;  %4813 = vmatpush3.msra.mxu1 %v5471_v34 }
 0x6c0   :  { %4815 = vmatmul.mubr.msk.f32.vlgmr.msra.gmra.mxu1 %vm232_vm6, %v390_v19  ;;  %4822 = vmatprep.subr.mxu1 %v5278_v44 }
 0x6c1   :  { %4823 = vmatpush3.msra.mxu1 %v803_v35  ;;  %4824 = vmatprep.mubr.msk.f32.mxu1 %vm5279_vm5, %v5278_v44 }
 0x6c2   :  { %4832 = vmatprep.subr.mxu1 %v5278_v44  ;;  %v959_v40 = vpop.permute.xlu0 %958 }
 0x6cc   :  { %v5116_v17 = vpop.eup %5115 }
 0x6cd   :  { %v797_v36 = vsel %vm232_vm6, %v5116_v17, 0.0 }
 0x6ce   :  { %798 = vadd.xlane.f32.xlu1 %v797_v36 }
 0x6df   :  { %956 = vrot.lane.b32.xlu1 %v5404_v46, %s5290_s1 }
 0x6e3   :  { %1045 = vrot.lane.b32.xlu1 %v5404_v46, %s5291_s16 }
 0x757   :  { %v799_v37 = vpop.xlane.xlu1 %798 }
 0x758   :  { %5117 = vrcp.f32 %v799_v37 }
 0x75b   :  { %v957_v41 = vpop.permute.xlu1 %956 }
 0x75f   :  { %v1046_v57 = vpop.permute.xlu1 %1045 }
 0x765   :  { %v5118_v38 = vpop.eup %5117 }
 0x766   :  { %v801_v39 = vmul.f32 %v5118_v38, %v5116_v17 }
 0x768   :  { %4825 = vmatmul.mubr.msk.f32.vlgmr.msra.gmra.mxu1 %vm232_vm6, %v801_v39 }
 0x769   :  { %4833 = vmatpush3.xpose.msk.msra.mxu1 %vm232_vm6, %v959_v40  ;;  %4834 = vmatprep.mubr.msk.f32.mxu1 %vm5279_vm5, %v5278_v44 }
 0x76a   :  { %4842 = vmatprep.subr.mxu1 %v5278_v44 }
 0x76c   :  { %4835 = vmatmul.mubr.msk.f32.vlgmr.msra.gmra.mxu1 %vm232_vm6, %v957_v41 }
 0x76d   :  { %4844 = vmatprep.mubr.msk.f32.mxu1 %vm5279_vm5, %v5278_v44 }
 0x780   :  { %v709_v42 = vpop.f32.mrf.mxu1 }
 0x781   :  { %v710_v3 = vadd.f32 %v709_v42, %v5463_v25 }
 0x782   :  { %v4816_v43 = vpop.f32.mrf.mxu1 }
 0x828   :  { %v874_v46 = vpop.f32.mrf.mxu1 }
 0x82a   :  { %v4826_v47 = vpop.f32.mrf.mxu1 }
 0x82c   :  { %v1030_v48 = vpop.f32.mrf.mxu1 }
 0x82d   :  { %v1031_v49 = vadd.f32 %v1030_v48, %v5423_v50 }
 0x82e   :  { %v4836_v51 = vpop.f32.mrf.mxu1 }
 0x82f   :  { %v1034_v52 = vsel %vm232_vm6, %v1031_v49, -inf }
 0x830   :  { %1035 = vmax.xlane.f32.xlu0 %v1034_v52 }
 0x846   :  { %879 = vrot.lane.b32.xlu0 %v5368_v15, %s5284_s10 }
 0x84a   :  { %1200 = vrot.lane.b32.xlu0 %v5402_v45, %s5281_s28 }
 0x84e   :  { %1363 = vrot.lane.b32.xlu0 %v5402_v45, %s5282_s8 }
 0x8b9   :  { %v1036_v53 = vpop.xlane.xlu0 %1035 }
 0x8ba   :  { %v1037_v54 = vsub.f32 %v1031_v49, %v1036_v53 }
 0x8bc   :  { %v1038_v55 = vmul.f32 1.442695, %v1037_v54 }
 0x8bd   :  { %v5500_v56 = vpop.permute.xlu0 %879 }
 0x8be   :  { %5119 = vpow2.f32 %v1038_v55  ;;  %4828 = vmatpush3.msra.mxu0 %v5500_v56 }
 0x8bf   :  { %4830 = vmatmul.mubr.msk.f32.vlgmr.msra.gmra.mxu0 %vm232_vm6, %v874_v46  ;;  %4837 = vmatprep.subr.mxu0 %v5278_v44 }
 0x8c0   :  { %4838 = vmatpush3.msra.mxu0 %v1046_v57  ;;  %4839 = vmatprep.mubr.msk.f32.mxu0 %vm5279_vm5, %v5278_v44 }
 0x8c1   :  { %4847 = vmatprep.subr.mxu0 %v5278_v44  ;;  %v1201_v62 = vpop.permute.xlu0 %1200 }
 0x8c5   :  { %v1364_v2 = vpop.permute.xlu0 %1363 }
 0x8cb   :  { %v5120_v15 = vpop.eup %5119 }
 0x8cc   :  { %v1040_v58 = vsel %vm232_vm6, %v5120_v15, 0.0 }
 0x8cd   :  { %1041 = vadd.xlane.f32.xlu1 %v1040_v58 }
 0x8de   :  { %1365 = vrot.lane.b32.xlu1 %v5402_v45, %s5280_s27 }
 0x956   :  { %v1042_v59 = vpop.xlane.xlu1 %1041 }
 0x957   :  { %5121 = vrcp.f32 %v1042_v59 }
 0x95a   :  { %v1366_v63 = vpop.permute.xlu1 %1365 }
 0x964   :  { %v5122_v60 = vpop.eup %5121 }
 0x965   :  { %v1044_v61 = vmul.f32 %v5122_v60, %v5120_v15 }
 0x967   :  { %4840 = vmatmul.mubr.msk.f32.vlgmr.msra.gmra.mxu0 %vm232_vm6, %v1044_v61 }
 0x968   :  { %4848 = vmatpush3.xpose.msk.msra.mxu0 %vm232_vm6, %v1201_v62  ;;  %4849 = vmatprep.mubr.msk.f32.mxu0 %vm5279_vm5, %v5278_v44 }
 0x969   :  { %4857 = vmatprep.subr.mxu0 %v5278_v44 }
 0x96b   :  { %4850 = vmatmul.mubr.msk.f32.vlgmr.msra.gmra.mxu0 %vm232_vm6, %v5402_v45 }
 0x96c   :  { %4858 = vmatpush3.xpose.msk.msra.mxu0 %vm232_vm6, %v1366_v63  ;;  %4859 = vmatprep.mubr.msk.f32.mxu0 %vm5279_vm5, %v5278_v44 }
 0x96d   :  { %4867 = vmatprep.subr.mxu0 %v5278_v44 }
 0x96f   :  { %4860 = vmatmul.mubr.msk.f32.vlgmr.msra.gmra.mxu0 %vm232_vm6, %v1364_v2 }
 0x970   :  { %4868 = vmatpush3.msra.mxu0 %v5440_v4  ;;  %4869 = vmatprep.mubr.msk.f32.mxu0 %vm5279_vm5, %v5278_v44 }
 0x971   :  { %4877 = vmatprep.subr.mxu0 %v5278_v44 }
 0x97f   :  { %v951_v5 = vpop.f32.mrf.mxu0 }
 0x980   :  { %v955_v6 = vadd.f32 %v951_v5, %v710_v3 }
 0x981   :  { %v4831_v7 = vpop.f32.mrf.mxu0 }
 0xa27   :  { %v1117_v8 = vpop.f32.mrf.mxu0 }
 0xa29   :  { %v4841_v9 = vpop.f32.mrf.mxu0 }
 0xa2b   :  { %v1272_v10 = vpop.f32.mrf.mxu0 }
 0xa2c   :  { %v1273_v11 = vadd.f32 %v1272_v10, %v5423_v50 }
 0xa2d   :  { %v4851_v12 = vpop.f32.mrf.mxu0 }
 0xa2e   :  { %v1276_v13 = vsel %vm232_vm6, %v1273_v11, -inf }
 0xa2f   :  { %1277 = vmax.xlane.f32.xlu1 %v1276_v13  ;;  %v1437_v4 = vpop.f32.mrf.mxu0 }
 0xa30   :  { %v1438_v16 = vadd.f32 %v1437_v4, %v5423_v50 }
 0xa31   :  { %v4861_v18 = vpop.f32.mrf.mxu0 }
 0xa32   :  { %v1441_v19 = vsel %vm232_vm6, %v1438_v16, -inf }
 0xa33   :  { %1442 = vmax.xlane.f32.xlu0 %v1441_v19 }
 0xa40   :  { %1122 = vrot.lane.b32.xlu1 %v5363_v14, %s5284_s10 }
 0xa44   :  { %1452 = vrot.lane.b32.xlu1 %v5402_v45, %s5288_s14 }
 0xa48   :  { %1676 = vrot.lane.b32.xlu1 %v5402_v45, %s5285_s11 }
 0xa4c   :  { %1674 = vrot.lane.b32.xlu1 %v5402_v45, %s5286_s12 }
 0xab8   :  { %v1278_v20 = vpop.xlane.xlu1 %1277 }
 0xab9   :  { %v1279_v21 = vsub.f32 %v1273_v11, %v1278_v20 }
 0xabb   :  { %v1280_v22 = vmul.f32 1.442695, %v1279_v21 }
 0xabc   :  { %v5540_v23 = vpop.permute.xlu1 %1122  ;;  %v1443_v24 = vpop.xlane.xlu0 %1442 }
 0xabd   :  { %5123 = vpow2.f32 %v1280_v22  ;;  %v1444_v25 = vsub.f32 %v1438_v16, %v1443_v24  ;;  %4843 = vmatpush3.msra.mxu1 %v5540_v23 }
 0xabe   :  { %4845 = vmatmul.mubr.msk.f32.vlgmr.msra.gmra.mxu1 %vm232_vm6, %v1117_v8  ;;  %4852 = vmatprep.subr.mxu1 %v5278_v44 }
 0xabf   :  { %v1445_v14 = vmul.f32 1.442695, %v1444_v25  ;;  %4854 = vmatprep.mubr.msk.f32.mxu1 %vm5279_vm5, %v5278_v44 }
 0xac0   :  { %v1453_v17 = vpop.permute.xlu1 %1452 }
 0xac1   :  { %5125 = vpow2.f32 %v1445_v14 }
 0xac4   :  { %v1677_v42 = vpop.permute.xlu1 %1676 }
 0xac8   :  { %v1675_v47 = vpop.permute.xlu1 %1674 }
 0xaca   :  { %v5124_v26 = vpop.eup %5123 }
 0xacb   :  { %v1282_v27 = vsel %vm232_vm6, %v5124_v26, 0.0 }
 0xacc   :  { %1283 = vadd.xlane.f32.xlu0 %v1282_v27 }
 0xace   :  { %v5126_v28 = vpop.eup %5125 }
 0xacf   :  { %v1447_v29 = vsel %vm232_vm6, %v5126_v28, 0.0 }
 0xad0   :  { %1448 = vadd.xlane.f32.xlu0 %v1447_v29 }
 0xae6   :  { %1287 = vrot.lane.b32.xlu0 %v5402_v45, %s5283_s9 }
 0xb55   :  { %v1284_v30 = vpop.xlane.xlu0 %1283 }
 0xb56   :  { %5127 = vrcp.f32 %v1284_v30 }
 0xb59   :  { %v1449_v31 = vpop.xlane.xlu0 %1448 }
 0xb5a   :  { %5129 = vrcp.f32 %v1449_v31 }
 0xb5d   :  { %v1288_v32 = vpop.permute.xlu0 %1287 }
 0xb5e   :  { %4853 = vmatpush3.msra.mxu1 %v1288_v32 }
 0xb5f   :  { %4862 = vmatprep.subr.mxu1 %v5278_v44 }
 0xb63   :  { %v5128_v33 = vpop.eup %5127 }
 0xb64   :  { %v1286_v35 = vmul.f32 %v5128_v33, %v5124_v26 }
 0xb66   :  { %4855 = vmatmul.mubr.msk.f32.vlgmr.msra.gmra.mxu1 %vm232_vm6, %v1286_v35 }
 0xb67   :  { %v5130_v36 = vpop.eup %5129  ;;  %4863 = vmatpush3.msra.mxu1 %v1453_v17  ;;  %4864 = vmatprep.mubr.msk.f32.mxu1 %vm5279_vm5, %v5278_v44 }
 0xb68   :  { %4872 = vmatprep.subr.mxu1 %v5278_v44  ;;  %v1451_v37 = vmul.f32 %v5130_v36, %v5126_v28 }
 0xb6a   :  { %4865 = vmatmul.mubr.msk.f32.vlgmr.msra.gmra.mxu1 %vm232_vm6, %v1451_v37  ;;  %v5618_v37 = vld [vmem:[%s5953_s4 + $0x50] sm:$0xff] }
 0xb6b   :  { %4873 = vmatpush3.msra.mxu1 %v5471_v34  ;;  %4874 = vmatprep.mubr.msk.f32.mxu1 %vm5279_vm5, %v5278_v44 }
 0xb6c   :  { %4882 = vmatprep.subr.mxu1 %v5278_v44 }
 0xb7e   :  { %v1194_v38 = vpop.f32.mrf.mxu1 }
 0xb7f   :  { %v1198_v39 = vadd.f32 %v1194_v38, %v955_v6  ;;  %v5623_v38 = vld [vmem:[%s5953_s4 + $0x38] sm:$0xff] }
 0xb80   :  { %v4846_v40 = vpop.f32.mrf.mxu1 }
 0xb81   :  { %v5598_v12 = vadd.f32 %v1198_v39, %v5348_v0  ;;  %v5642_v39 = vld [vmem:[%s5953_s4 + $0x8] sm:$0xff] }
 0xb83   :  { %v2156_v4 = vsel %vm94_vm0, %v5598_v12, 0.0 }
 0xc26   :  { %v1359_v41 = vpop.f32.mrf.mxu1 }
 0xc27   :  { %4875 = vmatmul.mubr.msk.f32.vlgmr.msra.gmra.mxu1 %vm232_vm6, %v1359_v41 }
 0xc28   :  { %v4856_v43 = vpop.f32.mrf.mxu1  ;;  %4884 = vmatprep.mubr.msk.f32.mxu1 %vm5279_vm5, %v5278_v44 }
 0xc2a   :  { %v1524_v46 = vpop.f32.mrf.mxu1 }
 0xc2b   :  { %4870 = vmatmul.mubr.msk.f32.vlgmr.msra.gmra.mxu0 %vm232_vm6, %v1524_v46 }
 0xc2c   :  { %4878 = vmatpush3.xpose.msk.msra.mxu0 %vm232_vm6, %v1677_v42  ;;  %v4866_v34 = vpop.f32.mrf.mxu1  ;;  %4879 = vmatprep.mubr.msk.f32.mxu0 %vm5279_vm5, %v5278_v44 }
 0xc2d   :  { %4887 = vmatprep.subr.mxu0 %v5278_v44 }
 0xc2f   :  { %4880 = vmatmul.mubr.msk.f32.vlgmr.msra.gmra.mxu0 %vm232_vm6, %v1675_v47 }
 0xc30   :  { %4888 = vmatpush3.msra.mxu0 %v5500_v56  ;;  %4889 = vmatprep.mubr.msk.f32.mxu0 %vm5279_vm5, %v5278_v44 }
 0xc31   :  { %4897 = vmatprep.subr.mxu0 %v5278_v44 }
 0xce7   :  { %v1670_v48 = vpop.f32.mrf.mxu1 }
 0xce9   :  { %v4876_v49 = vpop.f32.mrf.mxu1 }
 0xceb   :  { %v1597_v51 = vpop.f32.mrf.mxu0 }
 0xcec   :  { %v1671_v52 = vadd.f32 %v1670_v48, %v1597_v51 }
 0xced   :  { %v4871_v53 = vpop.f32.mrf.mxu0 }
 0xcef   :  { %v1748_v54 = vpop.f32.mrf.mxu0 }
 0xcf0   :  { %v1749_v55 = vadd.f32 %v1748_v54, %v5423_v50 }
 0xcf1   :  { %v4881_v57 = vpop.f32.mrf.mxu0 }
 0xcf2   :  { %v1752_v15 = vsel %vm232_vm6, %v1749_v55, -inf  ;;  %v4599_v57 = vld [vmem:[%s5955_s6 + $0x2] ss:$0 sm:$0xff] }
 0xcf3   :  { %1753 = vmax.xlane.f32.xlu0 %v1752_v15 }
 0xd09   :  { %1763 = vrot.lane.b32.xlu0 %v5402_v45, %s5287_s13 }
 0xd0d   :  { %1913 = vrot.lane.b32.xlu0 %v5402_v45, %s5290_s1 }
 0xd7c   :  { %v1754_v56 = vpop.xlane.xlu0 %1753 }
 0xd7d   :  { %v1755_v58 = vsub.f32 %v1749_v55, %v1754_v56  ;;  %v68_v56 = vld [vmem:[#allocation5] sm:$0xff] }
 0xd7f   :  { %v1756_v59 = vmul.f32 1.442695, %v1755_v58  ;;  %v4600_v58 = vld [vmem:[%s5955_s6 + $0x3] ss:$0 sm:$0xff] }
 0xd80   :  { %v1764_v60 = vpop.permute.xlu0 %1763 }
 0xd81   :  { %5131 = vpow2.f32 %v1756_v59  ;;  %4883 = vmatpush3.msra.mxu1 %v1764_v60 }
 0xd82   :  { %4892 = vmatprep.subr.mxu1 %v5278_v44 }
 0xd84   :  { %v1914_v6 = vpop.permute.xlu0 %1913 }
 0xd8e   :  { %v5132_v61 = vpop.eup %5131 }
 0xd8f   :  { %v1758_v62 = vsel %vm232_vm6, %v5132_v61, 0.0 }
 0xd90   :  { %1759 = vadd.xlane.f32.xlu1 %v1758_v62 }
 0xda1   :  { %1915 = vrot.lane.b32.xlu1 %v5402_v45, %s5289_s15 }
 0xe19   :  { %v1760_v63 = vpop.xlane.xlu1 %1759 }
 0xe1a   :  { %5133 = vrcp.f32 %v1760_v63 }
 0xe1d   :  { %v1916_v5 = vpop.permute.xlu1 %1915 }
 0xe27   :  { %v5134_v2 = vpop.eup %5133 }
 0xe28   :  { %v1762_v3 = vmul.f32 %v5134_v2, %v5132_v61 }
 0xe2a   :  { %4885 = vmatmul.mubr.msk.f32.vlgmr.msra.gmra.mxu1 %vm232_vm6, %v1762_v3 }
 0xe2b   :  { %4893 = vmatpush3.xpose.msk.msra.mxu1 %vm232_vm6, %v1916_v5  ;;  %4894 = vmatprep.mubr.msk.f32.mxu1 %vm5279_vm5, %v5278_v44 }
 0xe2c   :  { %4902 = vmatprep.subr.mxu1 %v5278_v44 }
 0xe2e   :  { %4895 = vmatmul.mubr.msk.f32.vlgmr.msra.gmra.mxu1 %vm232_vm6, %v1914_v6  ;;  %v69_v6 = vld [vmem:[#allocation5 + $0x8] sm:$0xff] }
 0xe2f   :  { %4903 = vmatpush3.msra.mxu1 %v5540_v23  ;;  %4904 = vmatprep.mubr.msk.f32.mxu1 %vm5279_vm5, %v5278_v44 }
 0xeea   :  { %v1835_v7 = vpop.f32.mrf.mxu1 }
 0xeeb   :  { %4890 = vmatmul.mubr.msk.f32.vlgmr.msra.gmra.mxu0 %vm232_vm6, %v1835_v7 }
 0xeec   :  { %v4886_v8 = vpop.f32.mrf.mxu1  ;;  %4899 = vmatprep.mubr.msk.f32.mxu0 %vm5279_vm5, %v5278_v44 }
 0xeee   :  { %v1987_v9 = vpop.f32.mrf.mxu1 }
 0xeef   :  { %v1988_v10 = vadd.f32 %v1987_v9, %v5423_v50 }
 0xef0   :  { %v4896_v11 = vpop.f32.mrf.mxu1 }
 0xef1   :  { %v1991_v13 = vsel %vm232_vm6, %v1988_v10, -inf }
 0xef2   :  { %1992 = vmax.xlane.f32.xlu1 %v1991_v13 }
 0xef6   :  { %2157 = vadd.xlane.f32.xlu1 %v2156_v4 }
 0xf7b   :  { %v1993_v16 = vpop.xlane.xlu1 %1992 }
 0xf7c   :  { %v1994_v18 = vsub.f32 %v1988_v10, %v1993_v16 }
 0xf7e   :  { %v1995_v19 = vmul.f32 1.442695, %v1994_v18 }
 0xf7f   :  { %v2158_v28 = vpop.xlane.xlu1 %2157 }
 0xf80   :  { %5135 = vpow2.f32 %v1995_v19  ;;  %v2162_v29 = vmul.f32 0.03125, %v2158_v28 }
 0xf8d   :  { %v5136_v20 = vpop.eup %5135 }
 0xf8e   :  { %v1997_v21 = vsel %vm232_vm6, %v5136_v20, 0.0 }
 0xf8f   :  { %1998 = vadd.xlane.f32.xlu0 %v1997_v21 }
 0xfa5   :  { %2002 = vrot.lane.b32.xlu0 %v5402_v45, %s5291_s16  ;;  %v2164_v45 = vsub.f32 %v5598_v12, %v2162_v29 }
 0xfa7   :  { %v2166_v17 = vmul.f32 %v2164_v45, %v2164_v45 }
 0xfa9   :  { %v2168_v36 = vsel %vm94_vm0, %v2166_v17, 0.0  ;;  %2297 = vrot.lane.b32.xlu0 %v5623_v38, %s5281_s28 }
 0xfab   :  { %v1908_v0 = vpop.f32.mrf.mxu0 }
 0xfac   :  { %v1912_v50 = vadd.f32 %v1908_v0, %v1671_v52 }
 0xfad   :  { %v4891_v22 = vpop.f32.mrf.mxu0 }
0x1018   :  { %v1999_v23 = vpop.xlane.xlu0 %1998 }
0x1019   :  { %5137 = vrcp.f32 %v1999_v23 }
0x101c   :  { %v2003_v24 = vpop.permute.xlu0 %2002 }
0x101d   :  { %4898 = vmatpush3.msra.mxu0 %v2003_v24  ;;  %v5696_v24 = vld [vmem:[%s5952_s3] ss:$0 sm:$0xff] }
0x101e   :  { %4907 = vmatprep.subr.mxu0 %v5618_v37 }
0x1020   :  { %v2298_v61 = vpop.permute.xlu0 %2297 }
0x1026   :  { %v5138_v25 = vpop.eup %5137 }
0x1027   :  { %v2001_v14 = vmul.f32 %v5138_v25, %v5136_v20 }
0x1029   :  { %4900 = vmatmul.mubr.msk.f32.vlgmr.msra.gmra.mxu0 %vm232_vm6, %v2001_v14 }
0x102a   :  { %4908 = vmatpush3.msra.mxu0 %v5618_v37 }
0x102b   :  { %4909 = vmatprep.subr.mxu0 %v5623_v38 }
0x102c   :  { %4910 = vmatpush3.msra.mxu0 %v5623_v38 }
0x10e9   :  { %v2074_v26 = vpop.f32.mrf.mxu0 }
0x10ea   :  { %4905 = vmatmul.mubr.msk.f32.vlgmr.msra.gmra.mxu1 %vm232_vm6, %v2074_v26 }
0x10eb   :  { %v4901_v27 = vpop.f32.mrf.mxu0  ;;  %4926 = vmatprep.mubr.msk.f32.mxu1 %vm94_vm0, %v68_v56 }
0x11aa   :  { %v2147_v30 = vpop.f32.mrf.mxu1 }
0x11ab   :  { %v2151_v31 = vadd.f32 %v2147_v30, %v1912_v50 }
0x11ac   :  { %v4906_v32 = vpop.f32.mrf.mxu1 }
0x11ad   :  { %v5610_v33 = vadd.f32 %v2151_v31, %v5350_v1  ;;  %v5631_v1 = vld [vmem:[%s5953_s4 + $0x20] sm:$0xff] }
0x11ae   :  { %2295 = vrot.lane.b32.xlu0 %v5631_v1, %s5281_s28  ;;  %4911 = vmatprep.subr.mxu0 %v5631_v1 }
0x11af   :  { %v2159_v35 = vsel %vm94_vm0, %v5610_v33, 0.0  ;;  %4912 = vmatpush3.msra.mxu0 %v5631_v1 }
0x11b0   :  { %2160 = vadd.xlane.f32.xlu1 %v2159_v35  ;;  %4913 = vmatprep.subr.mxu0 %v5642_v39 }
0x11b1   :  { %4914 = vmatpush3.msra.mxu0 %v5642_v39 }
0x11b2   :  { %2293 = vrot.lane.b32.xlu0 %v5642_v39, %s5281_s28  ;;  %4929 = vmatprep.subr.mxu0 %v5278_v44 }
0x11b4   :  { %2169 = vadd.xlane.f32.xlu1 %v2168_v36 }
0x1220   :  { %v2296_v2 = vpop.permute.xlu0 %2295 }
0x1224   :  { %v2294_v5 = vpop.permute.xlu0 %2293 }
0x1239   :  { %v2161_v40 = vpop.xlane.xlu1 %2160 }
0x123a   :  { %v2163_v41 = vmul.f32 0.03125, %v2161_v40 }
0x123c   :  { %v2165_v42 = vsub.f32 %v5610_v33, %v2163_v41 }
0x123d   :  { %v2170_v43 = vpop.xlane.xlu1 %2169 }
0x123e   :  { %v2174_v46 = vmul.f32 0.032258064, %v2170_v43  ;;  %v2167_v34 = vmul.f32 %v2165_v42, %v2165_v42 }
0x1240   :  { %5139 = vrsqrt.f32 %v2174_v46  ;;  %v2171_v47 = vsel %vm94_vm0, %v2167_v34, 0.0  ;;  %vm2178_vm7 = vcmp.eq.f32.partialorder %v2174_v46, inf  ;;  %v2181_v51 = vand.u32 2147483648, %v2174_v46 }
0x1241   :  { %2172 = vadd.xlane.f32.xlu1 %v2171_v47  ;;  %vm2180_vm8 = vcmp.eq.f32.partialorder %v2174_v46, 0.0 }
0x124d   :  { %v5140_v48 = vpop.eup %5139 }
0x124e   :  { %v2177_v49 = vmul.f32 %v5140_v48, %v2174_v46 }
0x1250   :  { %v2179_v52 = vsel %vm2178_vm7, %v2174_v46, %v2177_v49 }
0x1251   :  { %v2182_v53 = vsel %vm2180_vm8, %v2181_v51, %v2179_v52 }
0x1252   :  { %v2190_v54 = vadd.f32 1e-06, %v2182_v53  ;;  %2299 = vrot.lane.b32.xlu1 %v5618_v37, %s5281_s28 }
0x1254   :  { %5141 = vrcp.f32 %v2190_v54 }
0x1261   :  { %v5142_v55 = vpop.eup %5141 }
0x1262   :  { %v2194_v15 = vmul.f32 %v5142_v55, %v2164_v45 }
0x1264   :  { %v2200_v59 = vmul.f32 %v4599_v57, %v2194_v15 }
0x1266   :  { %v2206_v60 = vadd.f32 %v4600_v58, %v2200_v59 }
0x1268   :  { %4915 = vmatprep.mubr.msk.f32.mxu0 %vm94_vm0, %v2206_v60 }
0x12ca   :  { %v2173_v62 = vpop.xlane.xlu1 %2172 }
0x12cb   :  { %v2175_v63 = vmul.f32 0.032258064, %v2173_v62 }
0x12cd   :  { %5143 = vrsqrt.f32 %v2175_v63  ;;  %vm2185_vm9 = vcmp.eq.f32.partialorder %v2175_v63, inf  ;;  %v2188_v9 = vand.u32 2147483648, %v2175_v63  ;;  %vm2187_vm10 = vcmp.eq.f32.partialorder %v2175_v63, 0.0 }
0x12ce   :  { %v2300_v3 = vpop.permute.xlu1 %2299 }
0x12cf   :  { %4918 = vmatprep.subr.mxu1 %v2300_v3 }
0x12d0   :  { %4919 = vmatpush3.msra.mxu1 %v2300_v3 }
0x12d1   :  { %4920 = vmatprep.subr.mxu1 %v2298_v61 }
0x12d2   :  { %4921 = vmatpush3.msra.mxu1 %v2298_v61 }
0x12d3   :  { %4922 = vmatprep.subr.mxu1 %v2296_v2 }
0x12d4   :  { %4923 = vmatpush3.msra.mxu1 %v2296_v2 }
0x12d5   :  { %4924 = vmatprep.subr.mxu1 %v2294_v5 }
0x12d6   :  { %4925 = vmatpush3.msra.mxu1 %v2294_v5 }
0x12d7   :  { %4927 = vmatmul.mubr.msk.f32.vlgmr.msra.gmra.mxu1 %vm94_vm0, %v69_v6  ;;  %4934 = vmatprep.subr.mxu1 %v5278_v44 }
0x12d8   :  { %4936 = vmatprep.mubr.msk.f32.mxu1 %vm5279_vm5, %v5278_v44 }
0x12da   :  { %v5144_v7 = vpop.eup %5143 }
0x12db   :  { %v2184_v8 = vmul.f32 %v5144_v7, %v2175_v63 }
0x12dd   :  { %v2186_v10 = vsel %vm2185_vm9, %v2175_v63, %v2184_v8 }
0x12de   :  { %v2189_v11 = vsel %vm2187_vm10, %v2188_v9, %v2186_v10 }
0x12df   :  { %v2191_v13 = vadd.f32 1e-06, %v2189_v11 }
0x12e1   :  { %5145 = vrcp.f32 %v2191_v13 }
0x12ee   :  { %v5146_v4 = vpop.eup %5145 }
0x12ef   :  { %v2195_v16 = vmul.f32 %v5146_v4, %v2165_v42 }
0x12f1   :  { %v2201_v18 = vmul.f32 %v4599_v57, %v2195_v16 }
0x12f3   :  { %v2207_v19 = vadd.f32 %v4600_v58, %v2201_v18 }
0x12f5   :  { %4916 = vmatmul.mubr.msk.f32.vlgmr.msra.gmra.mxu0 %vm94_vm0, %v2207_v19 }
0x12f6   :  { %4931 = vmatprep.mubr.msk.f32.mxu0 %vm5279_vm5, %v5278_v44 }
0x1397   :  { %v5669_v20 = vpop.f32.mrf.mxu1 }
0x1399   :  { %v5671_v21 = vpop.f32.mrf.mxu1 }
0x139a   :  { %2557 = vrot.lane.b32.xlu0 %v5671_v21, %s5282_s8  ;;  %4930 = vmatpush3.xpose.msk.msra.mxu0 %vm232_vm6, %v5671_v21 }
0x139b   :  { %4939 = vmatprep.subr.mxu0 %v5278_v44 }
0x13b5   :  { %v5678_v0 = vpop.f32.mrf.mxu0 }
0x13b7   :  { %v5680_v50 = vpop.f32.mrf.mxu0 }
0x13b8   :  { %2555 = vrot.lane.b32.xlu1 %v5680_v50, %s5282_s8  ;;  %4932 = vmatmul.mubr.msk.f32.vlgmr.msra.gmra.mxu0 %vm232_vm6, %v5680_v50 }
0x13b9   :  { %4941 = vmatprep.mubr.msk.f32.mxu0 %vm5279_vm5, %v5278_v44 }
0x140c   :  { %v2558_v22 = vpop.permute.xlu0 %2557 }
0x140d   :  { %4940 = vmatpush3.xpose.msk.msra.mxu0 %vm232_vm6, %v2558_v22 }
0x140e   :  { %4949 = vmatprep.subr.mxu0 %v5278_v44 }
0x142a   :  { %v2556_v23 = vpop.permute.xlu1 %2555 }
0x142b   :  { %4942 = vmatmul.mubr.msk.f32.vlgmr.msra.gmra.mxu0 %vm232_vm6, %v2556_v23 }
0x142c   :  { %4951 = vmatprep.mubr.msk.f32.mxu0 %vm5279_vm5, %v5278_v44 }
0x1478   :  { %v2464_v25 = vpop.f32.mrf.mxu0 }
0x1479   :  { %v2465_v14 = vadd.f32 %v5696_v24, %v2464_v25 }
0x147a   :  { %v4933_v26 = vpop.f32.mrf.mxu0 }
0x147b   :  { %v2468_v27 = vsel %vm232_vm6, %v2465_v14, -inf }
0x147c   :  { %2469 = vmax.xlane.f32.xlu0 %v2468_v27 }
0x14eb   :  { %v2629_v28 = vpop.f32.mrf.mxu0 }
0x14ec   :  { %v2630_v29 = vadd.f32 %v5696_v24, %v2629_v28 }
0x14ed   :  { %v4943_v30 = vpop.f32.mrf.mxu0 }
0x14ee   :  { %v2633_v45 = vsel %vm232_vm6, %v2630_v29, -inf }
0x14ef   :  { %2634 = vmax.xlane.f32.xlu1 %v2633_v45 }
0x1500   :  { %2644 = vrot.lane.b32.xlu1 %v5671_v21, %s5280_s27 }
0x1504   :  { %2720 = vrot.lane.b32.xlu1 %v5631_v1, %s5284_s10 }
0x1505   :  { %v2470_v31 = vpop.xlane.xlu0 %2469 }
0x1506   :  { %v2471_v32 = vsub.f32 %v2465_v14, %v2470_v31 }
0x1508   :  { %v2472_v35 = vmul.f32 1.442695, %v2471_v32  ;;  %2874 = vrot.lane.b32.xlu1 %v5671_v21, %s5286_s12 }
0x150a   :  { %5147 = vpow2.f32 %v2472_v35 }
0x1517   :  { %v5148_v17 = vpop.eup %5147 }
0x1518   :  { %v2474_v36 = vsel %vm232_vm6, %v5148_v17, 0.0 }
0x1519   :  { %2475 = vadd.xlane.f32.xlu0 %v2474_v36 }
0x1578   :  { %v2635_v40 = vpop.xlane.xlu1 %2634 }
0x1579   :  { %v2636_v41 = vsub.f32 %v2630_v29, %v2635_v40 }
0x157b   :  { %v2637_v42 = vmul.f32 1.442695, %v2636_v41 }
0x157c   :  { %v2645_v43 = vpop.permute.xlu1 %2644 }
0x157d   :  { %5149 = vpow2.f32 %v2637_v42 }
0x1580   :  { %v5709_v46 = vpop.permute.xlu1 %2720 }
0x1581   :  { %4950 = vmatpush3.msra.mxu0 %v5709_v46 }
0x1582   :  { %4959 = vmatprep.subr.mxu0 %v5278_v44 }
0x1584   :  { %v2875_v56 = vpop.permute.xlu1 %2874 }
0x158a   :  { %v5150_v1 = vpop.eup %5149 }
0x158b   :  { %v2639_v34 = vsel %vm232_vm6, %v5150_v1, 0.0 }
0x158c   :  { %2640 = vadd.xlane.f32.xlu0 %v2639_v34 }
0x15a2   :  { %2479 = vrot.lane.b32.xlu0 %v5671_v21, %s5281_s28  ;;  %v2476_v47 = vpop.xlane.xlu0 %2475 }
0x15a3   :  { %5151 = vrcp.f32 %v2476_v47 }
0x15a6   :  { %2872 = vrot.lane.b32.xlu0 %v5680_v50, %s5286_s12 }
0x15b0   :  { %v5152_v49 = vpop.eup %5151 }
0x15b1   :  { %v2478_v52 = vmul.f32 %v5152_v49, %v5148_v17 }
0x1615   :  { %v2641_v48 = vpop.xlane.xlu0 %2640 }
0x1616   :  { %5153 = vrcp.f32 %v2641_v48 }
0x1619   :  { %v2480_v51 = vpop.permute.xlu0 %2479 }
0x161a   :  { %4935 = vmatpush3.msra.mxu1 %v2480_v51 }
0x161b   :  { %4937 = vmatmul.mubr.msk.f32.vlgmr.msra.gmra.mxu1 %vm232_vm6, %v2478_v52  ;;  %4944 = vmatprep.subr.mxu1 %v5278_v44 }
0x161c   :  { %4945 = vmatpush3.msra.mxu1 %v2645_v43  ;;  %4946 = vmatprep.mubr.msk.f32.mxu1 %vm5279_vm5, %v5278_v44 }
0x161d   :  { %4954 = vmatprep.subr.mxu1 %v5278_v44  ;;  %v2873_v59 = vpop.permute.xlu0 %2872 }
0x1623   :  { %v5154_v53 = vpop.eup %5153 }
0x1624   :  { %v2643_v54 = vmul.f32 %v5154_v53, %v5150_v1 }
0x1626   :  { %4947 = vmatmul.mubr.msk.f32.vlgmr.msra.gmra.mxu1 %vm232_vm6, %v2643_v54 }
0x1627   :  { %4956 = vmatprep.mubr.msk.f32.mxu1 %vm5279_vm5, %v5278_v44 }
0x16db   :  { %v2551_v55 = vpop.f32.mrf.mxu1 }
0x16dd   :  { %v4938_v57 = vpop.f32.mrf.mxu1 }
0x16e6   :  { %v2716_v15 = vpop.f32.mrf.mxu1 }
0x16e7   :  { %4952 = vmatmul.mubr.msk.f32.vlgmr.msra.gmra.mxu0 %vm232_vm6, %v2716_v15 }
0x16e8   :  { %4960 = vmatpush3.xpose.msk.msra.mxu0 %vm232_vm6, %v2875_v56  ;;  %v4948_v58 = vpop.f32.mrf.mxu1  ;;  %4961 = vmatprep.mubr.msk.f32.mxu0 %vm5279_vm5, %v5278_v44 }
0x16e9   :  { %4969 = vmatprep.subr.mxu0 %v5278_v44 }
0x16eb   :  { %4962 = vmatmul.mubr.msk.f32.vlgmr.msra.gmra.mxu0 %vm232_vm6, %v2873_v59 }
0x16ec   :  { %4971 = vmatprep.mubr.msk.f32.mxu0 %vm5279_vm5, %v5278_v44 }
0x17a7   :  { %v5734_v60 = vpop.f32.mrf.mxu0 }
0x17a9   :  { %v4953_v61 = vpop.f32.mrf.mxu0 }
0x17ab   :  { %v2946_v62 = vpop.f32.mrf.mxu0 }
0x17ac   :  { %v2947_v63 = vadd.f32 %v5696_v24, %v2946_v62 }
0x17ad   :  { %v4963_v2 = vpop.f32.mrf.mxu0 }
0x17ae   :  { %v2950_v3 = vsel %vm232_vm6, %v2947_v63, -inf }
0x17af   :  { %2951 = vmax.xlane.f32.xlu1 %v2950_v3 }
0x17c0   :  { %2961 = vrot.lane.b32.xlu1 %v5671_v21, %s5285_s11 }
0x17c4   :  { %3116 = vrot.lane.b32.xlu1 %v5671_v21, %s5290_s1 }
0x1838   :  { %v2952_v5 = vpop.xlane.xlu1 %2951 }
0x1839   :  { %v2953_v6 = vsub.f32 %v2947_v63, %v2952_v5 }
0x183b   :  { %v2954_v7 = vmul.f32 1.442695, %v2953_v6 }
0x183c   :  { %v2962_v13 = vpop.permute.xlu1 %2961 }
0x183d   :  { %5155 = vpow2.f32 %v2954_v7 }
0x1840   :  { %v3117_v16 = vpop.permute.xlu1 %3116 }
0x184a   :  { %v5156_v8 = vpop.eup %5155 }
0x184b   :  { %v2956_v9 = vsel %vm232_vm6, %v5156_v8, 0.0 }
0x184c   :  { %2957 = vadd.xlane.f32.xlu0 %v2956_v9 }
0x1862   :  { %2796 = vrot.lane.b32.xlu0 %v5642_v39, %s5284_s10 }
0x1866   :  { %3114 = vrot.lane.b32.xlu0 %v5680_v50, %s5290_s1 }
0x18d5   :  { %v2958_v10 = vpop.xlane.xlu0 %2957 }
0x18d6   :  { %5157 = vrcp.f32 %v2958_v10 }
0x18d9   :  { %v5747_v11 = vpop.permute.xlu0 %2796 }
0x18da   :  { %4955 = vmatpush3.msra.mxu1 %v5747_v11 }
0x18db   :  { %4957 = vmatmul.mubr.msk.f32.vlgmr.msra.gmra.mxu1 %vm232_vm6, %v2551_v55  ;;  %4964 = vmatprep.subr.mxu1 %v5278_v44 }
0x18dc   :  { %4965 = vmatpush3.msra.mxu1 %v2962_v13  ;;  %4966 = vmatprep.mubr.msk.f32.mxu1 %vm5279_vm5, %v5278_v44 }
0x18dd   :  { %4974 = vmatprep.subr.mxu1 %v5278_v44  ;;  %v3115_v18 = vpop.permute.xlu0 %3114 }
0x18e3   :  { %v5158_v39 = vpop.eup %5157 }
0x18e4   :  { %v2960_v4 = vmul.f32 %v5158_v39, %v5156_v8 }
0x18e6   :  { %4967 = vmatmul.mubr.msk.f32.vlgmr.msra.gmra.mxu1 %vm232_vm6, %v2960_v4 }
0x18e7   :  { %4975 = vmatpush3.xpose.msk.msra.mxu1 %vm232_vm6, %v3117_v16  ;;  %4976 = vmatprep.mubr.msk.f32.mxu1 %vm5279_vm5, %v5278_v44 }
0x18e8   :  { %4984 = vmatprep.subr.mxu1 %v5278_v44 }
0x18ea   :  { %4977 = vmatmul.mubr.msk.f32.vlgmr.msra.gmra.mxu1 %vm232_vm6, %v3115_v18 }
0x18eb   :  { %4986 = vmatprep.mubr.msk.f32.mxu1 %vm5279_vm5, %v5278_v44 }
0x199b   :  { %v2868_v19 = vpop.f32.mrf.mxu1 }
0x199c   :  { %v2869_v41 = vadd.f32 %v2868_v19, %v5734_v60 }
0x199d   :  { %v4958_v50 = vpop.f32.mrf.mxu1 }
0x19a6   :  { %v3033_v22 = vpop.f32.mrf.mxu1 }
0x19a8   :  { %v4968_v23 = vpop.f32.mrf.mxu1 }
0x19aa   :  { %v3188_v25 = vpop.f32.mrf.mxu1 }
0x19ab   :  { %v3189_v14 = vadd.f32 %v5696_v24, %v3188_v25 }
0x19ac   :  { %v4978_v26 = vpop.f32.mrf.mxu1 }
0x19ad   :  { %v3192_v27 = vsel %vm232_vm6, %v3189_v14, -inf }
0x19ae   :  { %3193 = vmax.xlane.f32.xlu1 %v3192_v27 }
0x19bf   :  { %3203 = vrot.lane.b32.xlu1 %v5671_v21, %s5289_s15 }
0x19c3   :  { %3521 = vrot.lane.b32.xlu1 %v5669_v20, %s5282_s8 }
0x1a37   :  { %v3194_v28 = vpop.xlane.xlu1 %3193 }
0x1a38   :  { %v3195_v29 = vsub.f32 %v3189_v14, %v3194_v28 }
0x1a3a   :  { %v3196_v30 = vmul.f32 1.442695, %v3195_v29 }
0x1a3b   :  { %v3204_v35 = vpop.permute.xlu1 %3203 }
0x1a3c   :  { %5159 = vpow2.f32 %v3196_v30 }
0x1a3f   :  { %v3522_v36 = vpop.permute.xlu1 %3521 }
0x1a49   :  { %v5160_v45 = vpop.eup %5159 }
0x1a4a   :  { %v3198_v31 = vsel %vm232_vm6, %v5160_v45, 0.0 }
0x1a4b   :  { %3199 = vadd.xlane.f32.xlu0 %v3198_v31 }
0x1a61   :  { %3037 = vrot.lane.b32.xlu0 %v5623_v38, %s5284_s10 }
0x1a65   :  { %3519 = vrot.lane.b32.xlu0 %v5678_v0, %s5282_s8 }
0x1ad4   :  { %v3200_v32 = vpop.xlane.xlu0 %3199 }
0x1ad5   :  { %5161 = vrcp.f32 %v3200_v32 }
0x1ad8   :  { %v5774_v21 = vpop.permute.xlu0 %3037 }
0x1ad9   :  { %4970 = vmatpush3.msra.mxu0 %v5774_v21 }
0x1ada   :  { %4972 = vmatmul.mubr.msk.f32.vlgmr.msra.gmra.mxu0 %vm232_vm6, %v3033_v22  ;;  %4979 = vmatprep.subr.mxu0 %v5278_v44 }
0x1adb   :  { %4980 = vmatpush3.msra.mxu0 %v3204_v35  ;;  %4981 = vmatprep.mubr.msk.f32.mxu0 %vm5279_vm5, %v5278_v44 }
0x1adc   :  { %4989 = vmatprep.subr.mxu0 %v5278_v44  ;;  %v3520_v40 = vpop.permute.xlu0 %3519 }
0x1ae2   :  { %v5162_v38 = vpop.eup %5161 }
0x1ae3   :  { %v3202_v17 = vmul.f32 %v5162_v38, %v5160_v45 }
0x1ae5   :  { %4982 = vmatmul.mubr.msk.f32.vlgmr.msra.gmra.mxu0 %vm232_vm6, %v3202_v17 }
0x1ae6   :  { %4990 = vmatpush3.xpose.msk.msra.mxu0 %vm232_vm6, %v5669_v20  ;;  %4991 = vmatprep.mubr.msk.f32.mxu0 %vm5279_vm5, %v5278_v44 }
0x1ae7   :  { %4999 = vmatprep.subr.mxu0 %v5278_v44 }
0x1ae9   :  { %4992 = vmatmul.mubr.msk.f32.vlgmr.msra.gmra.mxu0 %vm232_vm6, %v5678_v0 }
0x1aea   :  { %5000 = vmatpush3.xpose.msk.msra.mxu0 %vm232_vm6, %v3522_v36  ;;  %5001 = vmatprep.mubr.msk.f32.mxu0 %vm5279_vm5, %v5278_v44 }
0x1aeb   :  { %5009 = vmatprep.subr.mxu0 %v5278_v44 }
0x1aed   :  { %5002 = vmatmul.mubr.msk.f32.vlgmr.msra.gmra.mxu0 %vm232_vm6, %v3520_v40 }
0x1aee   :  { %5010 = vmatpush3.msra.mxu0 %v5709_v46  ;;  %5011 = vmatprep.mubr.msk.f32.mxu0 %vm5279_vm5, %v5278_v44 }
0x1aef   :  { %5019 = vmatprep.subr.mxu0 %v5278_v44 }
0x1b9a   :  { %v3109_v42 = vpop.f32.mrf.mxu0 }
0x1b9b   :  { %v3113_v43 = vadd.f32 %v3109_v42, %v2869_v41 }
0x1b9c   :  { %v4973_v1 = vpop.f32.mrf.mxu0 }
0x1ba5   :  { %v3275_v34 = vpop.f32.mrf.mxu0 }
0x1ba7   :  { %v4983_v47 = vpop.f32.mrf.mxu0 }
0x1ba9   :  { %v3428_v48 = vpop.f32.mrf.mxu0 }
0x1baa   :  { %v3429_v49 = vadd.f32 %v5696_v24, %v3428_v48 }
0x1bab   :  { %v4993_v51 = vpop.f32.mrf.mxu0 }
0x1bac   :  { %v3432_v52 = vsel %vm232_vm6, %v3429_v49, -inf }
0x1bad   :  { %3433 = vmax.xlane.f32.xlu1 %v3432_v52  ;;  %v3593_v46 = vpop.f32.mrf.mxu0 }
0x1bae   :  { %v3594_v53 = vadd.f32 %v5696_v24, %v3593_v46 }
0x1baf   :  { %v5003_v54 = vpop.f32.mrf.mxu0 }
0x1bb0   :  { %v3597_v55 = vsel %vm232_vm6, %v3594_v53, -inf }
0x1bb1   :  { %3598 = vmax.xlane.f32.xlu0 %v3597_v55 }
0x1bbe   :  { %3279 = vrot.lane.b32.xlu1 %v5618_v37, %s5284_s10 }
0x1bc2   :  { %3608 = vrot.lane.b32.xlu1 %v5669_v20, %s5280_s27 }
0x1bc6   :  { %3832 = vrot.lane.b32.xlu1 %v5669_v20, %s5286_s12 }
0x1bca   :  { %3830 = vrot.lane.b32.xlu1 %v5678_v0, %s5286_s12 }
0x1c36   :  { %v3434_v57 = vpop.xlane.xlu1 %3433 }
0x1c37   :  { %v3435_v15 = vsub.f32 %v3429_v49, %v3434_v57 }
0x1c39   :  { %v3436_v56 = vmul.f32 1.442695, %v3435_v15 }
0x1c3a   :  { %v5812_v58 = vpop.permute.xlu1 %3279  ;;  %v3599_v59 = vpop.xlane.xlu0 %3598 }
0x1c3b   :  { %5163 = vpow2.f32 %v3436_v56  ;;  %v3600_v60 = vsub.f32 %v3594_v53, %v3599_v59  ;;  %4985 = vmatpush3.msra.mxu1 %v5812_v58 }
0x1c3c   :  { %4987 = vmatmul.mubr.msk.f32.vlgmr.msra.gmra.mxu1 %vm232_vm6, %v3275_v34  ;;  %4994 = vmatprep.subr.mxu1 %v5278_v44 }
0x1c3d   :  { %v3601_v37 = vmul.f32 1.442695, %v3600_v60  ;;  %4996 = vmatprep.mubr.msk.f32.mxu1 %vm5279_vm5, %v5278_v44 }
0x1c3e   :  { %v3609_v9 = vpop.permute.xlu1 %3608 }
0x1c3f   :  { %5165 = vpow2.f32 %v3601_v37 }
0x1c42   :  { %v3833_v19 = vpop.permute.xlu1 %3832 }
0x1c46   :  { %v3831_v23 = vpop.permute.xlu1 %3830 }
0x1c48   :  { %v5164_v61 = vpop.eup %5163 }
0x1c49   :  { %v3438_v62 = vsel %vm232_vm6, %v5164_v61, 0.0 }
0x1c4a   :  { %3439 = vadd.xlane.f32.xlu0 %v3438_v62 }
0x1c4c   :  { %v5166_v63 = vpop.eup %5165 }
0x1c4d   :  { %v3603_v2 = vsel %vm232_vm6, %v5166_v63, 0.0 }
0x1c4e   :  { %3604 = vadd.xlane.f32.xlu0 %v3603_v2 }
0x1c64   :  { %3443 = vrot.lane.b32.xlu0 %v5669_v20, %s5281_s28 }
0x1cd3   :  { %v3440_v3 = vpop.xlane.xlu0 %3439 }
0x1cd4   :  { %5167 = vrcp.f32 %v3440_v3 }
0x1cd7   :  { %v3605_v5 = vpop.xlane.xlu0 %3604 }
0x1cd8   :  { %5169 = vrcp.f32 %v3605_v5 }
0x1cdb   :  { %v3444_v6 = vpop.permute.xlu0 %3443 }
0x1cdc   :  { %4995 = vmatpush3.msra.mxu1 %v3444_v6 }
0x1cdd   :  { %5004 = vmatprep.subr.mxu1 %v5278_v44 }
0x1ce1   :  { %v5168_v7 = vpop.eup %5167 }
0x1ce2   :  { %v3442_v8 = vmul.f32 %v5168_v7, %v5164_v61 }
0x1ce4   :  { %4997 = vmatmul.mubr.msk.f32.vlgmr.msra.gmra.mxu1 %vm232_vm6, %v3442_v8 }
0x1ce5   :  { %v5170_v10 = vpop.eup %5169  ;;  %5005 = vmatpush3.msra.mxu1 %v3609_v9  ;;  %5006 = vmatprep.mubr.msk.f32.mxu1 %vm5279_vm5, %v5278_v44 }
0x1ce6   :  { %5014 = vmatprep.subr.mxu1 %v5278_v44  ;;  %v3607_v13 = vmul.f32 %v5170_v10, %v5166_v63 }
0x1ce8   :  { %5007 = vmatmul.mubr.msk.f32.vlgmr.msra.gmra.mxu1 %vm232_vm6, %v3607_v13 }
0x1ce9   :  { %5015 = vmatpush3.msra.mxu1 %v5747_v11  ;;  %5016 = vmatprep.mubr.msk.f32.mxu1 %vm5279_vm5, %v5278_v44 }
0x1cea   :  { %5024 = vmatprep.subr.mxu1 %v5278_v44 }
0x1cfc   :  { %v3351_v39 = vpop.f32.mrf.mxu1 }
0x1cfd   :  { %v3355_v4 = vadd.f32 %v3351_v39, %v3113_v43 }
0x1cfe   :  { %v4988_v16 = vpop.f32.mrf.mxu1 }
0x1cff   :  { %v5870_v51 = vadd.f32 %v3355_v4, %v5598_v12 }
0x1d01   :  { %v4312_v46 = vsel %vm94_vm0, %v5870_v51, 0.0 }
0x1da4   :  { %v3515_v18 = vpop.f32.mrf.mxu1 }
0x1da5   :  { %5017 = vmatmul.mubr.msk.f32.vlgmr.msra.gmra.mxu1 %vm232_vm6, %v3515_v18 }
0x1da6   :  { %v4998_v50 = vpop.f32.mrf.mxu1  ;;  %5026 = vmatprep.mubr.msk.f32.mxu1 %vm5279_vm5, %v5278_v44 }
0x1da8   :  { %v3680_v22 = vpop.f32.mrf.mxu1 }
0x1da9   :  { %5012 = vmatmul.mubr.msk.f32.vlgmr.msra.gmra.mxu0 %vm232_vm6, %v3680_v22 }
0x1daa   :  { %5020 = vmatpush3.xpose.msk.msra.mxu0 %vm232_vm6, %v3833_v19  ;;  %v5008_v11 = vpop.f32.mrf.mxu1  ;;  %5021 = vmatprep.mubr.msk.f32.mxu0 %vm5279_vm5, %v5278_v44 }
0x1dab   :  { %5029 = vmatprep.subr.mxu0 %v5278_v44 }
0x1dad   :  { %5022 = vmatmul.mubr.msk.f32.vlgmr.msra.gmra.mxu0 %vm232_vm6, %v3831_v23 }
0x1dae   :  { %5030 = vmatpush3.msra.mxu0 %v5774_v21  ;;  %5031 = vmatprep.mubr.msk.f32.mxu0 %vm5279_vm5, %v5278_v44 }
0x1daf   :  { %5039 = vmatprep.subr.mxu0 %v5278_v44 }
0x1e65   :  { %v3826_v25 = vpop.f32.mrf.mxu1 }
0x1e67   :  { %v5018_v14 = vpop.f32.mrf.mxu1 }
0x1e69   :  { %v3753_v26 = vpop.f32.mrf.mxu0 }
0x1e6a   :  { %v3827_v27 = vadd.f32 %v3826_v25, %v3753_v26  ;;  %v4638_v26 = vld [vmem:[%s5955_s6 + $0x4] ss:$0 sm:$0xff] }
0x1e6b   :  { %v5013_v28 = vpop.f32.mrf.mxu0 }
0x1e6c   :  { %v83_v28 = vld [vmem:[%s5953_s4 + $0x58] sm:$0xff] }
0x1e6d   :  { %v3904_v29 = vpop.f32.mrf.mxu0 }
0x1e6e   :  { %v3905_v30 = vadd.f32 %v5696_v24, %v3904_v29  ;;  %v80_v29 = vld [vmem:[%s5953_s4 + $0x40] sm:$0xff] }
0x1e6f   :  { %v5023_v45 = vpop.f32.mrf.mxu0 }
0x1e70   :  { %v3908_v31 = vsel %vm232_vm6, %v3905_v30, -inf }
0x1e71   :  { %3909 = vmax.xlane.f32.xlu0 %v3908_v31  ;;  %v77_v31 = vld [vmem:[%s5953_s4 + $0x28] sm:$0xff] }
0x1e87   :  { %3919 = vrot.lane.b32.xlu0 %v5669_v20, %s5285_s11 }
0x1e8b   :  { %4069 = vrot.lane.b32.xlu0 %v5678_v0, %s5290_s1 }
0x1efa   :  { %v3910_v32 = vpop.xlane.xlu0 %3909 }
0x1efb   :  { %v3911_v21 = vsub.f32 %v3905_v30, %v3910_v32  ;;  %v4639_v30 = vld [vmem:[%s5955_s6 + $0x5] ss:$0 sm:$0xff] }
0x1efd   :  { %v3912_v35 = vmul.f32 1.442695, %v3911_v21  ;;  %v74_v21 = vld [vmem:[%s5953_s4 + $0x10] sm:$0xff] }
0x1efe   :  { %v3920_v38 = vpop.permute.xlu0 %3919 }
0x1eff   :  { %5171 = vpow2.f32 %v3912_v35  ;;  %5025 = vmatpush3.msra.mxu1 %v3920_v38  ;;  %v91_v35 = vld [vmem:[%s5954_s5 + $0x38] sm:$0xff]  ;;  %v90_v38 = vld [vmem:[%s5954_s5 + $0x30] sm:$0xff] }
0x1f00   :  { %5034 = vmatprep.subr.mxu1 %v5278_v44 }
0x1f02   :  { %v4070_v43 = vpop.permute.xlu0 %4069 }
0x1f0c   :  { %v5172_v17 = vpop.eup %5171 }
0x1f0d   :  { %v3914_v36 = vsel %vm232_vm6, %v5172_v17, 0.0 }
0x1f0e   :  { %3915 = vadd.xlane.f32.xlu1 %v3914_v36  ;;  %v88_v36 = vld [vmem:[%s5954_s5 + $0x20] sm:$0xff] }
0x1f1f   :  { %4071 = vrot.lane.b32.xlu1 %v5669_v20, %s5290_s1 }
0x1f97   :  { %v3916_v40 = vpop.xlane.xlu1 %3915 }
0x1f98   :  { %5173 = vrcp.f32 %v3916_v40 }
0x1f9b   :  { %v4072_v0 = vpop.permute.xlu1 %4071 }
0x1fa5   :  { %v5174_v41 = vpop.eup %5173 }
0x1fa6   :  { %v3918_v42 = vmul.f32 %v5174_v41, %v5172_v17  ;;  %v89_v17 = vld [vmem:[%s5954_s5 + $0x28] sm:$0xff] }
0x1fa8   :  { %5027 = vmatmul.mubr.msk.f32.vlgmr.msra.gmra.mxu1 %vm232_vm6, %v3918_v42 }
0x1fa9   :  { %5035 = vmatpush3.xpose.msk.msra.mxu1 %vm232_vm6, %v4072_v0  ;;  %5036 = vmatprep.mubr.msk.f32.mxu1 %vm5279_vm5, %v5278_v44 }
0x1faa   :  { %5044 = vmatprep.subr.mxu1 %v5278_v44 }
0x1fac   :  { %5037 = vmatmul.mubr.msk.f32.vlgmr.msra.gmra.mxu1 %vm232_vm6, %v4070_v43 }
0x1fad   :  { %5045 = vmatpush3.msra.mxu1 %v5812_v58  ;;  %5046 = vmatprep.mubr.msk.f32.mxu1 %vm5279_vm5, %v5278_v44 }
0x1fae   :  { %5060 = vmatprep.subr.mxu1 %v91_v35 }
0x2068   :  { %v3991_v1 = vpop.f32.mrf.mxu1 }
0x2069   :  { %5032 = vmatmul.mubr.msk.f32.vlgmr.msra.gmra.mxu0 %vm232_vm6, %v3991_v1 }
0x206a   :  { %v5028_v34 = vpop.f32.mrf.mxu1  ;;  %5041 = vmatprep.mubr.msk.f32.mxu0 %vm5279_vm5, %v5278_v44 }
0x206c   :  { %v4143_v47 = vpop.f32.mrf.mxu1 }
0x206d   :  { %v4144_v48 = vadd.f32 %v5696_v24, %v4143_v47 }
0x206e   :  { %v5038_v49 = vpop.f32.mrf.mxu1 }
0x206f   :  { %v4147_v52 = vsel %vm232_vm6, %v4144_v48, -inf }
0x2070   :  { %4148 = vmax.xlane.f32.xlu1 %v4147_v52 }
0x2074   :  { %4313 = vadd.xlane.f32.xlu1 %v4312_v46 }
0x20f9   :  { %v4149_v53 = vpop.xlane.xlu1 %4148 }
0x20fa   :  { %v4150_v54 = vsub.f32 %v4144_v48, %v4149_v53  ;;  %v87_v53 = vld [vmem:[%s5954_s5 + $0x18] sm:$0xff] }
0x20fc   :  { %v4151_v55 = vmul.f32 1.442695, %v4150_v54  ;;  %v86_v54 = vld [vmem:[%s5954_s5 + $0x10] sm:$0xff] }
0x20fd   :  { %v4314_v62 = vpop.xlane.xlu1 %4313 }
0x20fe   :  { %5175 = vpow2.f32 %v4151_v55  ;;  %v4318_v63 = vmul.f32 0.03125, %v4314_v62  ;;  %v85_v55 = vld [vmem:[%s5954_s5 + $0x8] sm:$0xff] }
0x210b   :  { %v5176_v57 = vpop.eup %5175 }
0x210c   :  { %v4153_v44 = vsel %vm232_vm6, %v5176_v57, 0.0 }
0x210d   :  { %4154 = vadd.xlane.f32.xlu0 %v4153_v44  ;;  %v4640_v44 = vld [vmem:[%s5955_s6 + $0x6] ss:$0 sm:$0xff] }
0x2123   :  { %4158 = vrot.lane.b32.xlu0 %v5669_v20, %s5289_s15  ;;  %v4320_v20 = vsub.f32 %v5870_v51, %v4318_v63 }
0x2125   :  { %v4322_v8 = vmul.f32 %v4320_v20, %v4320_v20 }
0x2127   :  { %v4324_v9 = vsel %vm94_vm0, %v4322_v8, 0.0 }
0x2129   :  { %v4064_v12 = vpop.f32.mrf.mxu0 }
0x212a   :  { %v4068_v24 = vadd.f32 %v4064_v12, %v3827_v27 }
0x212b   :  { %v5033_v15 = vpop.f32.mrf.mxu0 }
0x2196   :  { %v4155_v56 = vpop.xlane.xlu0 %4154 }
0x2197   :  { %5177 = vrcp.f32 %v4155_v56 }
0x219a   :  { %v4159_v58 = vpop.permute.xlu0 %4158 }
0x219b   :  { %5040 = vmatpush3.msra.mxu0 %v4159_v58 }
0x219c   :  { %5049 = vmatprep.subr.mxu0 %v83_v28 }
0x21a4   :  { %v5178_v59 = vpop.eup %5177 }
0x21a5   :  { %v4157_v60 = vmul.f32 %v5178_v59, %v5176_v57  ;;  %v84_v57 = vld [vmem:[%s5954_s5] sm:$0xff]  ;;  %s5292_s5 = smov [#allocation8]  }
0x21a6   :  { %s4550_s12 = sshll.u32 %s5292_s5, 4  ;;  %s4551_s12 = int_to_ptr.vmem [resolvable:$true] %s4550_s12 }
0x21a7   :  { %5042 = vmatmul.mubr.msk.f32.vlgmr.msra.gmra.mxu0 %vm232_vm6, %v4157_v60  ;;  %s5247_s14 = scalar_lea.vmem %s4551_s12, 256  ;;  %p5252_p2 = scmp.lt.s32.totalorder %s4551_s12, %s4551_s12 }
0x21a8   :  { %5050 = vmatpush3.msra.mxu0 %v83_v28  ;;  %p5248_p1 = scmp.ne.s32.totalorder %s4551_s12, %s5247_s14  ;;  %p5253_p3 = scmp.lt.s32.totalorder %s5247_s14, %s5247_s14 }
0x21a9   :  { %5051 = vmatprep.subr.mxu0 %v80_v29 }
0x21aa   :  { %5052 = vmatpush3.msra.mxu0 %v80_v29  ;;  %p5254_p4 = por %p5253_p3, %p5252_p2 }
0x21ab   :  { %5053 = vmatprep.subr.mxu0 %v77_v31 }
0x21ac   :  { %5054 = vmatpush3.msra.mxu0 %v77_v31  ;;  %p5255_p5 = pnand %p5254_p4, %p5248_p1 }
0x21ad   :  { %5055 = vmatprep.subr.mxu0 %v74_v21 }
0x21ae   :  { %5056 = vmatpush3.msra.mxu0 %v74_v21 }
0x2267   :  { %v4230_v37 = vpop.f32.mrf.mxu0 }
0x2268   :  { %5047 = vmatmul.mubr.msk.f32.vlgmr.msra.gmra.mxu1 %vm232_vm6, %v4230_v37  ;;  %v4645_v37 = vld [vmem:[%s5955_s6 + $0x7] ss:$0 sm:$0xff] }
0x2269   :  { %v5043_v61 = vpop.f32.mrf.mxu0  ;;  %5061 = vmatpush3.msra.mxu1 %v91_v35 }
0x226a   :  { %5062 = vmatprep.subr.mxu1 %v90_v38 }
0x226b   :  { %5063 = vmatpush3.msra.mxu1 %v90_v38 }
0x226c   :  { %5064 = vmatprep.subr.mxu1 %v89_v17 }
0x226d   :  { %5065 = vmatpush3.msra.mxu1 %v89_v17 }
0x226e   :  { %5066 = vmatprep.subr.mxu1 %v88_v36 }
0x226f   :  { %5067 = vmatpush3.msra.mxu1 %v88_v36 }
0x2270   :  { %5068 = vmatprep.subr.mxu1 %v87_v53 }
0x2271   :  { %5069 = vmatpush3.msra.mxu1 %v87_v53 }
0x2272   :  { %5070 = vmatprep.subr.mxu1 %v86_v54 }
0x2273   :  { %5071 = vmatpush3.msra.mxu1 %v86_v54 }
0x2274   :  { %5072 = vmatprep.subr.mxu1 %v85_v55 }
0x2275   :  { %5073 = vmatpush3.msra.mxu1 %v85_v55 }
0x2276   :  { %5074 = vmatprep.subr.mxu1 %v84_v57 }
0x2277   :  { %5075 = vmatpush3.msra.mxu1 %v84_v57 }
0x2328   :  { %v4303_v2 = vpop.f32.mrf.mxu1 }
0x2329   :  { %v4307_v3 = vadd.f32 %v4303_v2, %v4068_v24 }
0x232a   :  { %v5048_v5 = vpop.f32.mrf.mxu1 }
0x232b   :  { %v5882_v6 = vadd.f32 %v4307_v3, %v5610_v33 }
0x232d   :  { %v4315_v7 = vsel %vm94_vm0, %v5882_v6, 0.0 }
0x232e   :  { %4316 = vadd.xlane.f32.xlu1 %v4315_v7 }
0x2332   :  { %4325 = vadd.xlane.f32.xlu1 %v4324_v9 }
0x23b7   :  { %v4317_v10 = vpop.xlane.xlu1 %4316 }
0x23b8   :  { %v4319_v13 = vmul.f32 0.03125, %v4317_v10 }
0x23ba   :  { %v4321_v39 = vsub.f32 %v5882_v6, %v4319_v13 }
0x23bb   :  { %v4326_v4 = vpop.xlane.xlu1 %4325 }
0x23bc   :  { %v4330_v16 = vmul.f32 0.032258064, %v4326_v4  ;;  %v4323_v18 = vmul.f32 %v4321_v39, %v4321_v39 }
0x23be   :  { %5179 = vrsqrt.f32 %v4330_v16  ;;  %v4327_v19 = vsel %vm94_vm0, %v4323_v18, 0.0  ;;  %vm4334_vm11 = vcmp.eq.f32.partialorder %v4330_v16, inf  ;;  %v4337_v22 = vand.u32 2147483648, %v4330_v16 }
0x23bf   :  { %4328 = vadd.xlane.f32.xlu1 %v4327_v19  ;;  %vm4336_vm12 = vcmp.eq.f32.partialorder %v4330_v16, 0.0 }
0x23cb   :  { %v5180_v33 = vpop.eup %5179 }
0x23cc   :  { %v4333_v50 = vmul.f32 %v5180_v33, %v4330_v16 }
0x23ce   :  { %v4335_v11 = vsel %vm4334_vm11, %v4330_v16, %v4333_v50 }
0x23cf   :  { %v4338_v23 = vsel %vm4336_vm12, %v4337_v22, %v4335_v11 }
0x23d0   :  { %v4346_v25 = vadd.f32 1e-06, %v4338_v23 }
0x23d2   :  { %5181 = vrcp.f32 %v4346_v25 }
0x23df   :  { %v5182_v14 = vpop.eup %5181 }
0x23e0   :  { %v4350_v27 = vmul.f32 %v5182_v14, %v4320_v20 }
0x23e2   :  { %v4356_v45 = vmul.f32 %v4638_v26, %v4350_v27 }
0x23e4   :  { %v4362_v32 = vadd.f32 %v4639_v30, %v4356_v45 }
0x23e6   :  { %5057 = vmatprep.mubr.msk.f32.mxu0 %vm94_vm0, %v4362_v32 }
0x2448   :  { %v4329_v40 = vpop.xlane.xlu1 %4328 }
0x2449   :  { %v4331_v41 = vmul.f32 0.032258064, %v4329_v40 }
0x244b   :  { %5183 = vrsqrt.f32 %v4331_v41  ;;  %vm4341_vm13 = vcmp.eq.f32.partialorder %v4331_v41, inf  ;;  %v4344_v43 = vand.u32 2147483648, %v4331_v41  ;;  %vm4343_vm14 = vcmp.eq.f32.partialorder %v4331_v41, 0.0 }
0x2458   :  { %v5184_v42 = vpop.eup %5183 }
0x2459   :  { %v4340_v0 = vmul.f32 %v5184_v42, %v4331_v41 }
0x245b   :  { %v4342_v1 = vsel %vm4341_vm13, %v4331_v41, %v4340_v0 }
0x245c   :  { %v4345_v34 = vsel %vm4343_vm14, %v4344_v43, %v4342_v1 }
0x245d   :  { %v4347_v47 = vadd.f32 1e-06, %v4345_v34 }
0x245f   :  { %5185 = vrcp.f32 %v4347_v47 }
0x246c   :  { %v5186_v48 = vpop.eup %5185 }
0x246d   :  { %v4351_v49 = vmul.f32 %v5186_v48, %v4321_v39 }
0x246f   :  { %v4357_v52 = vmul.f32 %v4638_v26, %v4351_v49 }
0x2471   :  { %v4363_v46 = vadd.f32 %v4639_v30, %v4357_v52 }
0x2473   :  { %5058 = vmatmul.mubr.msk.f32.vlgmr.msra.gmra.mxu0 %vm94_vm0, %v4363_v46 }
0x2533   :  { %v5059_v12 = vpop.f32.mrf.mxu0 }
0x2534   :  { %v4447_v24 = vadd.f32 %v5059_v12, %v4640_v44 }
0x2535   :  { %v4441_v15 = vpop.f32.mrf.mxu0 }
0x2536   :  { %v4442_v56 = vadd.f32 %v4640_v44, %v4441_v15  ;;  %v4451_v59 = vmax.f32 %v4447_v24, 0.0 }
0x2538   :  { %v4450_v58 = vmax.f32 %v4442_v56, 0.0 }
0x253a   :  { %5076 = vmatprep.mubr.msk.f32.mxu1 %vm4452_vm15, %v4450_v58 }
0x253b   :  { %5077 = vmatmul.mubr.msk.f32.vlgmr.msra.gmra.mxu1 %vm4452_vm15, %v4451_v59 }
0x25fb   :  { %v5078_v60 = vpop.f32.mrf.mxu1 }
0x25fc   :  { %v4535_v61 = vadd.f32 %v5078_v60, %v5882_v6 }
0x25fd   :  { %v4525_v62 = vpop.f32.mrf.mxu1 }
0x25fe   :  { %v4542_v63 = vadd.f32 %v4645_v37, %v4535_v61  ;;  %v4534_v2 = vadd.f32 %v4525_v62, %v5870_v51 }
0x2600   :  { %4544 = vst.msk [vmem:[#allocation8 + $0x8] sm:$0xff] %vm94_vm0, %v4542_v63  ;;  %v4541_v20 = vadd.f32 %v4645_v37, %v4534_v2 }
0x2602   :  { %4543 = vst.msk [vmem:[#allocation8] sm:$0xff] %vm94_vm0, %v4541_v20 }
0x2603   :  { %5258 = shalt.err (!%p5255_p5)
}
0x2604   :  { %4556 = dma.vmem_to_hbm [thread:$0]  %s4551_s12, 256, %s5956_s7, [#allocation4], %s5275_s29, %s5275_s29, %s5276_s30  }
0x2605   :  { %5271 = dma.done.wait [#allocation4], 256  }
0x2606   :  { %5272 = vsyncadd [#allocation4], 4294967040 }
0x2607   :  { %4560 = vsyncpa [#allocation3], 1 }
0x2608   :  { %4561 = vsyncpa [#allocation6], 1 }
0x2609   :  { %4562 = vsyncpa [#allocation4], 1 }

</bundles_post_ra>
